<compile_context>
chip_gen: v5e
topology: v5e:2x2
jax: 0.10.0
libtpu: 0.0.40
codegen_flags: <defaults>
</compile_context>

<pallas_src>
import math
from functools import partial

import numpy as np
import jax
import jax.numpy as jnp
from jax import lax
from jax.experimental import pallas as pl
from jax.experimental.pallas import tpu as pltpu


# Depthwise tap orderings -- must match weight.reshape(C, ntaps) row-major order.
_TAPS_3x3 = tuple((di, dj) for di in (-1, 0, 1) for dj in (-1, 0, 1))
_TAPS_1x5 = tuple((0, dj) for dj in (-2, -1, 0, 1, 2))
_TAPS_5x1 = tuple((di, 0) for di in (-2, -1, 0, 1, 2))


# ------------------------------- fused kernel --------------------------------

def _act(y, kind):
    if kind == "relu":
        return jnp.maximum(y, 0.0)
    if kind == "sigmoid":
        return jax.nn.sigmoid(y)
    return y


def _pw(xin, w_ref, b_ref, kind):
    # 1x1 conv (+ folded BN): (Cout, Cin) @ (Cin, n) + (Cout, 1)
    y = jnp.dot(w_ref[...], xin, preferred_element_type=jnp.float32)
    return _act(y + b_ref[...], kind)


def _dw(xin, w_ref, b_ref, mask_ref, taps, width, kind):
    """Depthwise conv (+ folded BN) on a channels-first (C, Hd*Wd) flat tile.

    Taps are lane shifts.  When the flat spatial width is a multiple of 128
    lanes, each tap is one pltpu.roll (XLU rotate) of the raw tile; the
    precomputed masks zero every lane whose logical read wraps or leaves the
    image, so the result equals a zero-padded conv.  For sub-128-lane tiles
    (half-res gate branch) we keep the zero-extend + static-slice fallback.
    """
    C, n = xin.shape
    wts = w_ref[...]                          # (C, ntaps)   hoisted load
    msk = mask_ref[...]                       # (ntaps, n)   hoisted load
    center = taps.index((0, 0))
    # Center tap: zero shift, all-ones mask -> no roll, no mask multiply.
    acc = xin * wts[:, center:center + 1]

    use_roll = (n % 128) == 0
    if not use_roll:
        pad = (max(abs(di) for di, _ in taps) * width
               + max(abs(dj) for _, dj in taps))
        z = jnp.zeros((C, pad), xin.dtype)
        xp = jnp.concatenate([z, xin, z], axis=1)     # (C, n + 2*pad)

    for t, (di, dj) in enumerate(taps):
        if t == center:
            continue
        s = di * width + dj                   # logical read offset (+s lanes)
        if use_roll:
            v = pltpu.roll(xin, (-s) % n, 1)  # v[:, l] == xin[:, l + s] (mod n)
        else:
            v = xp[:, pad + s:pad + s + n]
        acc = acc + (v * msk[t:t + 1, :]) * wts[:, t:t + 1]
    return _act(acc + b_ref[...], kind)


def _ghostblock_kernel(x_ref,
                       p1w_ref, p1b_ref, c1w_ref, c1b_ref,
                       s0w_ref, s0b_ref, s1w_ref, s1b_ref, s2w_ref, s2b_ref,
                       p2wa_ref, p2wb_ref, p2b_ref, c2w_ref, c2b_ref,
                       pool_ref, up_ref, m33_ref, m15_ref, m51_ref,
                       o_ref, *, width_full, width_half, init1, init2):
    """One batch element; every tensor lives as (channels, H*W), lanes = H*W."""
    x = x_ref[0]                                     # (Cin, H*W) f32

    # ---------------- ghost1 gate branch (half resolution) ----------------
    # avgpool2x2 -> 1x1 -> dw1x5 -> dw5x1 -> sigmoid -> bilinear upsample.
    # TODO(synk): the pool/upsample matmuls use dense Kronecker matrices; fine
    # at this tile size (<=64 KiB, one small MXU op each) but they must become
    # separable per-axis matmuls when H-tiling for realistic activation sizes.
    pooled = jnp.dot(x, pool_ref[...], preferred_element_type=jnp.float32)   # (Cin, HW/4)
    res = _pw(pooled, s0w_ref, s0b_ref, "none")                              # (num_mid, HW/4)
    res = _dw(res, s1w_ref, s1b_ref, m15_ref, _TAPS_1x5, width_half, "none")
    res = _dw(res, s2w_ref, s2b_ref, m51_ref, _TAPS_5x1, width_half, "sigmoid")
    gate = jnp.dot(res, up_ref[...], preferred_element_type=jnp.float32)     # (num_mid, HW)
    gate_a = gate[:init1]                                                    # (init1, HW)
    gate_b = gate[init1:]                                                    # (init1, HW)

    # ---------------- ghost1 main branch ----------------
    x1 = _pw(x, p1w_ref, p1b_ref, "relu")                                    # (init1, HW)
    x2 = _dw(x1, c1w_ref, c1b_ref, m33_ref, _TAPS_3x3, width_full, "relu")   # (init1, HW)
    x1g = x1 * gate_a
    x2g = x2 * gate_b

    # ---------------- ghost2 = GhostModule (use_act=False) ----------------
    # Primary 1x1 over the virtual concat [x1g; x2g]: split the weight along
    # its input-channel axis -> two small matmuls, no sublane-misaligned concat.
    y1 = (jnp.dot(p2wa_ref[...], x1g, preferred_element_type=jnp.float32)
          + jnp.dot(p2wb_ref[...], x2g, preferred_element_type=jnp.float32)
          + p2b_ref[...])                                                    # (init2, HW)
    y2 = _dw(y1, c2w_ref, c2b_ref, m33_ref, _TAPS_3x3, width_full, "none")   # (init2, HW)

    # identity shortcut (stride=1, num_in == num_out); write as two slabs so
    # no (num_out, HW) concatenated temporary is ever built.
    o_ref[0, :init2, :] = (x[:init2] + y1).astype(o_ref.dtype)
    o_ref[0, init2:, :] = (x[init2:] + y2).astype(o_ref.dtype)


# ----------------------- host-precomputed constants --------------------------

def _bilinear_matrix(out_size, in_size):
    """Interpolation matrix matching F.interpolate(mode='bilinear', align_corners=True)."""
    M = np.zeros((out_size, in_size), np.float32)
    if in_size == 1:
        M[:, 0] = 1.0
        return M
    src = np.arange(out_size, dtype=np.float64) * (in_size - 1) / (out_size - 1)
    i0 = np.minimum(np.floor(src).astype(np.int64), in_size - 2)
    frac = src - i0
    M[np.arange(out_size), i0] = (1.0 - frac).astype(np.float32)
    M[np.arange(out_size), i0 + 1] += frac.astype(np.float32)
    return M


def _pool_matrix(out_size, in_size):
    """AvgPool(kernel=2, stride=2) along one axis as a (out, in) matrix."""
    P = np.zeros((out_size, in_size), np.float32)
    idx = np.arange(out_size)
    P[idx, 2 * idx] = 0.5
    P[idx, 2 * idx + 1] = 0.5
    return P


def _tap_masks(Hd, Wd, taps):
    """1.0 where the shifted read stays inside the Hd x Wd image, else 0.0."""
    n = Hd * Wd
    h = np.arange(n) // Wd
    w = np.arange(n) % Wd
    m = np.zeros((len(taps), n), np.float32)
    for t, (di, dj) in enumerate(taps):
        valid = (h + di >= 0) & (h + di < Hd) & (w + dj >= 0) & (w + dj < Wd)
        m[t] = valid.astype(np.float32)
    return m


def make_constants(H, W):
    H2, W2 = H // 2, W // 2
    Ph, Pw = _pool_matrix(H2, H), _pool_matrix(W2, W)
    Mh, Mw = _bilinear_matrix(H, H2), _bilinear_matrix(W, W2)
    return {
        "pool_T": jnp.asarray(np.kron(Ph, Pw).T),          # (H*W, H2*W2)
        "up_T":   jnp.asarray(np.kron(Mh, Mw).T),          # (H2*W2, H*W)
        "m33":    jnp.asarray(_tap_masks(H, W, _TAPS_3x3)),
        "m15":    jnp.asarray(_tap_masks(H2, W2, _TAPS_1x5)),
        "m51":    jnp.asarray(_tap_masks(H2, W2, _TAPS_5x1)),
    }


# -------------------------------- parameters ---------------------------------

def _fold_bn(w, bn, eps=1e-5):
    """Fold inference-mode BatchNorm into a bias-free conv (out-channels = axis 0)."""
    gamma, beta, mean, var = bn
    scale = gamma / jnp.sqrt(var + eps)
    w = w * scale.reshape((-1,) + (1,) * (w.ndim - 1))
    return w, beta - mean * scale


def init_params(key, num_in, num_mid, num_out):
    init1 = math.ceil(num_mid / 2)   # ghost1 init channels (ratio=2 -> new == init)
    init2 = math.ceil(num_out / 2)   # ghost2 init channels
    keys = iter(jax.random.split(key, 64))

    def conv_w(shape):
        return 0.1 * jax.random.normal(next(keys), shape, jnp.float32)

    def bn(c):
        gamma = 1.0 + 0.1 * jax.random.normal(next(keys), (c,), jnp.float32)
        beta = 0.1 * jax.random.normal(next(keys), (c,), jnp.float32)
        mean = 0.1 * jax.random.normal(next(keys), (c,), jnp.float32)
        var = 1.0 + 0.1 * jnp.abs(jax.random.normal(next(keys), (c,), jnp.float32))
        return gamma, beta, mean, var

    p = {}
    # ghost1 = GhostModuleMul (kernel_size=1, act=relu)
    p["p1_w"], p["p1_b"] = _fold_bn(conv_w((init1, num_in)), bn(init1))       # primary 1x1 (OI)
    p["c1_w"], p["c1_b"] = _fold_bn(conv_w((init1, 3, 3)), bn(init1))         # cheap dw 3x3
    p["s0_w"], p["s0_b"] = _fold_bn(conv_w((num_mid, num_in)), bn(num_mid))   # short 1x1
    p["s1_w"], p["s1_b"] = _fold_bn(conv_w((num_mid, 1, 5)), bn(num_mid))     # short dw 1x5
    p["s2_w"], p["s2_b"] = _fold_bn(conv_w((num_mid, 5, 1)), bn(num_mid))     # short dw 5x1
    # ghost2 = GhostModule (kernel_size=1, use_act=False)
    p["p2_w"], p["p2_b"] = _fold_bn(conv_w((init2, num_mid)), bn(init2))      # primary 1x1
    p["c2_w"], p["c2_b"] = _fold_bn(conv_w((init2, 3, 3)), bn(init2))         # cheap dw 3x3
    return p


# ------------------------------ Pallas wrapper --------------------------------

@jax.jit
def ghostblockv2_pallas(x_nchw, p, consts):
    B, Cin, H, W = x_nchw.shape
    HW = H * W
    init1, init2 = p["p1_w"].shape[0], p["p2_w"].shape[0]
    num_mid, num_out = 2 * init1, 2 * init2
    x_flat = x_nchw.reshape(B, Cin, HW)              # channels-first, lane-dense HW

    def col(b):                                      # bias as a (C, 1) column
        return b.reshape(-1, 1)

    weights = (
        p["p1_w"], col(p["p1_b"]),
        p["c1_w"].reshape(init1, 9), col(p["c1_b"]),
        p["s0_w"], col(p["s0_b"]),
        p["s1_w"].reshape(num_mid, 5), col(p["s1_b"]),
        p["s2_w"].reshape(num_mid, 5), col(p["s2_b"]),
        p["p2_w"][:, :init1], p["p2_w"][:, init1:], col(p["p2_b"]),
        p["c2_w"].reshape(init2, 9), col(p["c2_b"]),
        consts["pool_T"], consts["up_T"],
        consts["m33"], consts["m15"], consts["m51"],
    )

    def const_spec(a):
        # TODO(synk): once these constants reach MiB scale (realistic sizes),
        # add pipeline_mode=pl.Buffered(1) to avoid double-buffering them.
        return pl.BlockSpec(a.shape, lambda b, nd=a.ndim: (0,) * nd)

    out = pl.pallas_call(
        partial(_ghostblock_kernel, width_full=W, width_half=W // 2,
                init1=init1, init2=init2),
        out_shape=jax.ShapeDtypeStruct((B, num_out, HW), jnp.float32),
        grid=(B,),   # one element per step keeps >=2 parallel steps for v7x's 2 TCs
        in_specs=[pl.BlockSpec((1, Cin, HW), lambda b: (b, 0, 0))]
                 + [const_spec(a) for a in weights],
        out_specs=pl.BlockSpec((1, num_out, HW), lambda b: (b, 0, 0)),
        # identity residual -> reuse the input HBM buffer for the output
        input_output_aliases=({0: 0} if Cin == num_out else {}),
        compiler_params=pltpu.CompilerParams(
            dimension_semantics=("parallel",),
            vmem_limit_bytes=32 * 1024 * 1024),
    )(x_flat, *weights)
    return out.reshape(B, num_out, H, W)


# ---------------------------- pure-JAX reference ------------------------------

def _act_ref(y, kind):
    if kind == "relu":
        return jnp.maximum(y, 0.0)
    if kind == "sigmoid":
        return jax.nn.sigmoid(y)
    return y


def _pw_ref(x, w, b, kind):
    y = lax.conv_general_dilated(
        x, w.reshape(w.shape[0], w.shape[1], 1, 1), (1, 1), "VALID",
        dimension_numbers=("NCHW", "OIHW", "NCHW"),
        precision=lax.Precision.HIGHEST) + b.reshape(1, -1, 1, 1)
    return _act_ref(y, kind)


def _dw_ref(x, w, b, pad, kind):
    C, kh, kw = w.shape
    y = lax.conv_general_dilated(
        x, w.reshape(C, 1, kh, kw), (1, 1),
        ((pad[0], pad[0]), (pad[1], pad[1])),
        dimension_numbers=("NCHW", "OIHW", "NCHW"), feature_group_count=C,
        precision=lax.Precision.HIGHEST) + b.reshape(1, -1, 1, 1)
    return _act_ref(y, kind)


def ghostblockv2_ref(x, p):
    B, C, H, W = x.shape
    res = x.reshape(B, C, H // 2, 2, W // 2, 2).mean(axis=(3, 5))      # AvgPool2d(2,2)
    res = _pw_ref(res, p["s0_w"], p["s0_b"], "none")
    res = _dw_ref(res, p["s1_w"], p["s1_b"], (0, 2), "none")
    res = _dw_ref(res, p["s2_w"], p["s2_b"], (2, 0), "sigmoid")
    x1 = _pw_ref(x, p["p1_w"], p["p1_b"], "relu")
    x2 = _dw_ref(x1, p["c1_w"], p["c1_b"], (1, 1), "relu")
    out = jnp.concatenate([x1, x2], axis=1)
    Mh = jnp.asarray(_bilinear_matrix(H, H // 2))
    Mw = jnp.asarray(_bilinear_matrix(W, W // 2))
    gate = jnp.einsum("hH,wW,bcHW->bchw", Mh, Mw, res,
                      precision=lax.Precision.HIGHEST)
    out = out * gate
    y1 = _pw_ref(out, p["p2_w"], p["p2_b"], "none")
    y2 = _dw_ref(y1, p["c2_w"], p["c2_b"], (1, 1), "none")
    return x + jnp.concatenate([y1, y2], axis=1)


# ------------------------------------ main ------------------------------------

if __name__ == "__main__":
    jax.config.update("jax_default_matmul_precision", "highest")

    key = jax.random.PRNGKey(0)
    kx, kp = jax.random.split(key)

    # Ghostblockv2(num_in=8, num_mid=8, num_out=8, kernel_size=3, stride=1)
    B, C, H, W = 2, 8, 16, 16
    num_in = num_mid = num_out = 8

    x = jax.random.normal(kx, (B, C, H, W), jnp.float32)   # PyTorch NCHW input
    params = init_params(kp, num_in, num_mid, num_out)
    consts = make_constants(H, W)

    ref = ghostblockv2_ref(x, params)                      # reference first

    out = ghostblockv2_pallas(x, params, consts)
    out = jax.block_until_ready(out)
    assert out.shape == (B, num_out, H, W)

    np.testing.assert_allclose(np.asarray(out), np.asarray(ref),
                               rtol=1e-3, atol=1e-3)
    print("KERNEL_OK")
</pallas_src>

<mosaic_0001>
module attributes {stable_mosaic.version = 11 : i64} {
  func.func @_ghostblock_kernel(%arg0: i32, %arg1: memref<1x8x256xf32, #tpu.memory_space<vmem>>, %arg2: memref<4x8xf32, #tpu.memory_space<vmem>>, %arg3: memref<4x1xf32, #tpu.memory_space<vmem>>, %arg4: memref<4x9xf32, #tpu.memory_space<vmem>>, %arg5: memref<4x1xf32, #tpu.memory_space<vmem>>, %arg6: memref<8x8xf32, #tpu.memory_space<vmem>>, %arg7: memref<8x1xf32, #tpu.memory_space<vmem>>, %arg8: memref<8x5xf32, #tpu.memory_space<vmem>>, %arg9: memref<8x1xf32, #tpu.memory_space<vmem>>, %arg10: memref<8x5xf32, #tpu.memory_space<vmem>>, %arg11: memref<8x1xf32, #tpu.memory_space<vmem>>, %arg12: memref<4x4xf32, #tpu.memory_space<vmem>>, %arg13: memref<4x4xf32, #tpu.memory_space<vmem>>, %arg14: memref<4x1xf32, #tpu.memory_space<vmem>>, %arg15: memref<4x9xf32, #tpu.memory_space<vmem>>, %arg16: memref<4x1xf32, #tpu.memory_space<vmem>>, %arg17: memref<256x64xf32, #tpu.memory_space<vmem>>, %arg18: memref<64x256xf32, #tpu.memory_space<vmem>>, %arg19: memref<9x256xf32, #tpu.memory_space<vmem>>, %arg20: memref<5x64xf32, #tpu.memory_space<vmem>>, %arg21: memref<5x64xf32, #tpu.memory_space<vmem>>, %arg22: memref<1x8x256xf32, #tpu.memory_space<vmem>>) attributes {dimension_semantics = [#tpu.dimension_semantics<parallel>], iteration_bounds = array<i64: 2>, scalar_prefetch = 0 : i64, scratch_operands = 0 : i64, tpu.core_type = #tpu.core_type<tc>, window_params = [{transform_indices = @transform_0, window_bounds = array<i64: 1, 8, 256>}, {pipeline_mode = #tpu.pipeline_mode<synchronous>, transform_indices = @transform_1, window_bounds = array<i64: 4, 8>}, {pipeline_mode = #tpu.pipeline_mode<synchronous>, transform_indices = @transform_2, window_bounds = array<i64: 4, 1>}, {pipeline_mode = #tpu.pipeline_mode<synchronous>, transform_indices = @transform_3, window_bounds = array<i64: 4, 9>}, {pipeline_mode = #tpu.pipeline_mode<synchronous>, transform_indices = @transform_4, window_bounds = array<i64: 4, 1>}, {pipeline_mode = #tpu.pipeline_mode<synchronous>, transform_indices = @transform_5, window_bounds = array<i64: 8, 8>}, {pipeline_mode = #tpu.pipeline_mode<synchronous>, transform_indices = @transform_6, window_bounds = array<i64: 8, 1>}, {pipeline_mode = #tpu.pipeline_mode<synchronous>, transform_indices = @transform_7, window_bounds = array<i64: 8, 5>}, {pipeline_mode = #tpu.pipeline_mode<synchronous>, transform_indices = @transform_8, window_bounds = array<i64: 8, 1>}, {pipeline_mode = #tpu.pipeline_mode<synchronous>, transform_indices = @transform_9, window_bounds = array<i64: 8, 5>}, {pipeline_mode = #tpu.pipeline_mode<synchronous>, transform_indices = @transform_10, window_bounds = array<i64: 8, 1>}, {pipeline_mode = #tpu.pipeline_mode<synchronous>, transform_indices = @transform_11, window_bounds = array<i64: 4, 4>}, {pipeline_mode = #tpu.pipeline_mode<synchronous>, transform_indices = @transform_12, window_bounds = array<i64: 4, 4>}, {pipeline_mode = #tpu.pipeline_mode<synchronous>, transform_indices = @transform_13, window_bounds = array<i64: 4, 1>}, {pipeline_mode = #tpu.pipeline_mode<synchronous>, transform_indices = @transform_14, window_bounds = array<i64: 4, 9>}, {pipeline_mode = #tpu.pipeline_mode<synchronous>, transform_indices = @transform_15, window_bounds = array<i64: 4, 1>}, {pipeline_mode = #tpu.pipeline_mode<synchronous>, transform_indices = @transform_16, window_bounds = array<i64: 256, 64>}, {pipeline_mode = #tpu.pipeline_mode<synchronous>, transform_indices = @transform_17, window_bounds = array<i64: 64, 256>}, {pipeline_mode = #tpu.pipeline_mode<synchronous>, transform_indices = @transform_18, window_bounds = array<i64: 9, 256>}, {pipeline_mode = #tpu.pipeline_mode<synchronous>, transform_indices = @transform_19, window_bounds = array<i64: 5, 64>}, {pipeline_mode = #tpu.pipeline_mode<synchronous>, transform_indices = @transform_20, window_bounds = array<i64: 5, 64>}, {transform_indices = @transform_21, window_bounds = array<i64: 1, 8, 256>}]} {
    %c0 = arith.constant 0 : index
    %c0_0 = arith.constant 0 : index
    %c0_1 = arith.constant 0 : index
    %0 = vector.load %arg1[%c0, %c0_0, %c0_1] : memref<1x8x256xf32, #tpu.memory_space<vmem>>, vector<1x8x256xf32>
    %1 = vector.shape_cast %0 : vector<1x8x256xf32> to vector<8x256xf32>
    %c0_2 = arith.constant 0 : index
    %c0_3 = arith.constant 0 : index
    %2 = vector.load %arg17[%c0_2, %c0_3] : memref<256x64xf32, #tpu.memory_space<vmem>>, vector<256x64xf32>
    %cst = arith.constant dense<0.000000e+00> : vector<8x64xf32>
    %3 = tpu.matmul %1, %2, %cst {dimension_numbers = #tpu.dot_dimension_numbers<[1], [0], [0], [1], [0, 0, 1, 1], [], []>, precision = #tpu.contract_precision<fp32>} : vector<8x256xf32>, vector<256x64xf32>, vector<8x64xf32> -> vector<8x64xf32>
    %c0_4 = arith.constant 0 : index
    %c0_5 = arith.constant 0 : index
    %4 = vector.load %arg6[%c0_4, %c0_5] : memref<8x8xf32, #tpu.memory_space<vmem>>, vector<8x8xf32>
    %cst_6 = arith.constant dense<0.000000e+00> : vector<8x64xf32>
    %5 = tpu.matmul %4, %3, %cst_6 {dimension_numbers = #tpu.dot_dimension_numbers<[1], [0], [0], [1], [0, 0, 1, 1], [], []>, precision = #tpu.contract_precision<fp32>} : vector<8x8xf32>, vector<8x64xf32>, vector<8x64xf32> -> vector<8x64xf32>
    %c0_7 = arith.constant 0 : index
    %c0_8 = arith.constant 0 : index
    %6 = vector.load %arg7[%c0_7, %c0_8] : memref<8x1xf32, #tpu.memory_space<vmem>>, vector<8x1xf32>
    %7 = vector.broadcast %6 : vector<8x1xf32> to vector<8x64xf32>
    %8 = arith.addf %5, %7 : vector<8x64xf32>
    %c0_9 = arith.constant 0 : index
    %c0_10 = arith.constant 0 : index
    %9 = vector.load %arg8[%c0_9, %c0_10] : memref<8x5xf32, #tpu.memory_space<vmem>>, vector<8x5xf32>
    %c0_11 = arith.constant 0 : index
    %c0_12 = arith.constant 0 : index
    %10 = vector.load %arg20[%c0_11, %c0_12] : memref<5x64xf32, #tpu.memory_space<vmem>>, vector<5x64xf32>
    %11 = vector.extract_strided_slice %9 {offsets = [0, 2], sizes = [8, 1], strides = [1, 1]} : vector<8x5xf32> to vector<8x1xf32>
    %12 = vector.broadcast %11 : vector<8x1xf32> to vector<8x64xf32>
    %13 = arith.mulf %8, %12 : vector<8x64xf32>
    %cst_13 = arith.constant 0.000000e+00 : f32
    %14 = vector.broadcast %cst_13 : f32 to vector<8x2xf32>
    %15 = tpu.concatenate %14, %8, %14 in 1 : vector<8x2xf32>, vector<8x64xf32>, vector<8x2xf32> -> vector<8x68xf32>
    %16 = vector.extract_strided_slice %15 {offsets = [0, 0], sizes = [8, 64], strides = [1, 1]} : vector<8x68xf32> to vector<8x64xf32>
    %17 = vector.extract_strided_slice %10 {offsets = [0, 0], sizes = [1, 64], strides = [1, 1]} : vector<5x64xf32> to vector<1x64xf32>
    %18 = vector.broadcast %17 : vector<1x64xf32> to vector<8x64xf32>
    %19 = arith.mulf %16, %18 : vector<8x64xf32>
    %20 = vector.extract_strided_slice %9 {offsets = [0, 0], sizes = [8, 1], strides = [1, 1]} : vector<8x5xf32> to vector<8x1xf32>
    %21 = vector.broadcast %20 : vector<8x1xf32> to vector<8x64xf32>
    %22 = arith.mulf %19, %21 : vector<8x64xf32>
    %23 = arith.addf %13, %22 : vector<8x64xf32>
    %24 = vector.extract_strided_slice %15 {offsets = [0, 1], sizes = [8, 64], strides = [1, 1]} : vector<8x68xf32> to vector<8x64xf32>
    %25 = vector.extract_strided_slice %10 {offsets = [1, 0], sizes = [1, 64], strides = [1, 1]} : vector<5x64xf32> to vector<1x64xf32>
    %26 = vector.broadcast %25 : vector<1x64xf32> to vector<8x64xf32>
    %27 = arith.mulf %24, %26 : vector<8x64xf32>
    %28 = vector.extract_strided_slice %9 {offsets = [0, 1], sizes = [8, 1], strides = [1, 1]} : vector<8x5xf32> to vector<8x1xf32>
    %29 = vector.broadcast %28 : vector<8x1xf32> to vector<8x64xf32>
    %30 = arith.mulf %27, %29 : vector<8x64xf32>
    %31 = arith.addf %23, %30 : vector<8x64xf32>
    %32 = vector.extract_strided_slice %15 {offsets = [0, 3], sizes = [8, 64], strides = [1, 1]} : vector<8x68xf32> to vector<8x64xf32>
    %33 = vector.extract_strided_slice %10 {offsets = [3, 0], sizes = [1, 64], strides = [1, 1]} : vector<5x64xf32> to vector<1x64xf32>
    %34 = vector.broadcast %33 : vector<1x64xf32> to vector<8x64xf32>
    %35 = arith.mulf %32, %34 : vector<8x64xf32>
    %36 = vector.extract_strided_slice %9 {offsets = [0, 3], sizes = [8, 1], strides = [1, 1]} : vector<8x5xf32> to vector<8x1xf32>
    %37 = vector.broadcast %36 : vector<8x1xf32> to vector<8x64xf32>
    %38 = arith.mulf %35, %37 : vector<8x64xf32>
    %39 = arith.addf %31, %38 : vector<8x64xf32>
    %40 = vector.extract_strided_slice %15 {offsets = [0, 4], sizes = [8, 64], strides = [1, 1]} : vector<8x68xf32> to vector<8x64xf32>
    %41 = vector.extract_strided_slice %10 {offsets = [4, 0], sizes = [1, 64], strides = [1, 1]} : vector<5x64xf32> to vector<1x64xf32>
    %42 = vector.broadcast %41 : vector<1x64xf32> to vector<8x64xf32>
    %43 = arith.mulf %40, %42 : vector<8x64xf32>
    %44 = vector.extract_strided_slice %9 {offsets = [0, 4], sizes = [8, 1], strides = [1, 1]} : vector<8x5xf32> to vector<8x1xf32>
    %45 = vector.broadcast %44 : vector<8x1xf32> to vector<8x64xf32>
    %46 = arith.mulf %43, %45 : vector<8x64xf32>
    %47 = arith.addf %39, %46 : vector<8x64xf32>
    %c0_14 = arith.constant 0 : index
    %c0_15 = arith.constant 0 : index
    %48 = vector.load %arg9[%c0_14, %c0_15] : memref<8x1xf32, #tpu.memory_space<vmem>>, vector<8x1xf32>
    %49 = vector.broadcast %48 : vector<8x1xf32> to vector<8x64xf32>
    %50 = arith.addf %47, %49 : vector<8x64xf32>
    %c0_16 = arith.constant 0 : index
    %c0_17 = arith.constant 0 : index
    %51 = vector.load %arg10[%c0_16, %c0_17] : memref<8x5xf32, #tpu.memory_space<vmem>>, vector<8x5xf32>
    %c0_18 = arith.constant 0 : index
    %c0_19 = arith.constant 0 : index
    %52 = vector.load %arg21[%c0_18, %c0_19] : memref<5x64xf32, #tpu.memory_space<vmem>>, vector<5x64xf32>
    %53 = vector.extract_strided_slice %51 {offsets = [0, 2], sizes = [8, 1], strides = [1, 1]} : vector<8x5xf32> to vector<8x1xf32>
    %54 = vector.broadcast %53 : vector<8x1xf32> to vector<8x64xf32>
    %55 = arith.mulf %50, %54 : vector<8x64xf32>
    %cst_20 = arith.constant 0.000000e+00 : f32
    %56 = vector.broadcast %cst_20 : f32 to vector<8x16xf32>
    %57 = tpu.concatenate %56, %50, %56 in 1 : vector<8x16xf32>, vector<8x64xf32>, vector<8x16xf32> -> vector<8x96xf32>
    %58 = vector.extract_strided_slice %57 {offsets = [0, 0], sizes = [8, 64], strides = [1, 1]} : vector<8x96xf32> to vector<8x64xf32>
    %59 = vector.extract_strided_slice %52 {offsets = [0, 0], sizes = [1, 64], strides = [1, 1]} : vector<5x64xf32> to vector<1x64xf32>
    %60 = vector.broadcast %59 : vector<1x64xf32> to vector<8x64xf32>
    %61 = arith.mulf %58, %60 : vector<8x64xf32>
    %62 = vector.extract_strided_slice %51 {offsets = [0, 0], sizes = [8, 1], strides = [1, 1]} : vector<8x5xf32> to vector<8x1xf32>
    %63 = vector.broadcast %62 : vector<8x1xf32> to vector<8x64xf32>
    %64 = arith.mulf %61, %63 : vector<8x64xf32>
    %65 = arith.addf %55, %64 : vector<8x64xf32>
    %66 = vector.extract_strided_slice %57 {offsets = [0, 8], sizes = [8, 64], strides = [1, 1]} : vector<8x96xf32> to vector<8x64xf32>
    %67 = vector.extract_strided_slice %52 {offsets = [1, 0], sizes = [1, 64], strides = [1, 1]} : vector<5x64xf32> to vector<1x64xf32>
    %68 = vector.broadcast %67 : vector<1x64xf32> to vector<8x64xf32>
    %69 = arith.mulf %66, %68 : vector<8x64xf32>
    %70 = vector.extract_strided_slice %51 {offsets = [0, 1], sizes = [8, 1], strides = [1, 1]} : vector<8x5xf32> to vector<8x1xf32>
    %71 = vector.broadcast %70 : vector<8x1xf32> to vector<8x64xf32>
    %72 = arith.mulf %69, %71 : vector<8x64xf32>
    %73 = arith.addf %65, %72 : vector<8x64xf32>
    %74 = vector.extract_strided_slice %57 {offsets = [0, 24], sizes = [8, 64], strides = [1, 1]} : vector<8x96xf32> to vector<8x64xf32>
    %75 = vector.extract_strided_slice %52 {offsets = [3, 0], sizes = [1, 64], strides = [1, 1]} : vector<5x64xf32> to vector<1x64xf32>
    %76 = vector.broadcast %75 : vector<1x64xf32> to vector<8x64xf32>
    %77 = arith.mulf %74, %76 : vector<8x64xf32>
    %78 = vector.extract_strided_slice %51 {offsets = [0, 3], sizes = [8, 1], strides = [1, 1]} : vector<8x5xf32> to vector<8x1xf32>
    %79 = vector.broadcast %78 : vector<8x1xf32> to vector<8x64xf32>
    %80 = arith.mulf %77, %79 : vector<8x64xf32>
    %81 = arith.addf %73, %80 : vector<8x64xf32>
    %82 = vector.extract_strided_slice %57 {offsets = [0, 32], sizes = [8, 64], strides = [1, 1]} : vector<8x96xf32> to vector<8x64xf32>
    %83 = vector.extract_strided_slice %52 {offsets = [4, 0], sizes = [1, 64], strides = [1, 1]} : vector<5x64xf32> to vector<1x64xf32>
    %84 = vector.broadcast %83 : vector<1x64xf32> to vector<8x64xf32>
    %85 = arith.mulf %82, %84 : vector<8x64xf32>
    %86 = vector.extract_strided_slice %51 {offsets = [0, 4], sizes = [8, 1], strides = [1, 1]} : vector<8x5xf32> to vector<8x1xf32>
    %87 = vector.broadcast %86 : vector<8x1xf32> to vector<8x64xf32>
    %88 = arith.mulf %85, %87 : vector<8x64xf32>
    %89 = arith.addf %81, %88 : vector<8x64xf32>
    %c0_21 = arith.constant 0 : index
    %c0_22 = arith.constant 0 : index
    %90 = vector.load %arg11[%c0_21, %c0_22] : memref<8x1xf32, #tpu.memory_space<vmem>>, vector<8x1xf32>
    %91 = vector.broadcast %90 : vector<8x1xf32> to vector<8x64xf32>
    %92 = arith.addf %89, %91 : vector<8x64xf32>
    %93 = arith.negf %92 : vector<8x64xf32>
    %94 = math.exp %93 : vector<8x64xf32>
    %cst_23 = arith.constant 1.000000e+00 : f32
    %95 = vector.broadcast %cst_23 : f32 to vector<8x64xf32>
    %96 = arith.addf %95, %94 : vector<8x64xf32>
    %97 = arith.divf %95, %96 : vector<8x64xf32>
    %c0_24 = arith.constant 0 : index
    %c0_25 = arith.constant 0 : index
    %98 = vector.load %arg18[%c0_24, %c0_25] : memref<64x256xf32, #tpu.memory_space<vmem>>, vector<64x256xf32>
    %cst_26 = arith.constant dense<0.000000e+00> : vector<8x256xf32>
    %99 = tpu.matmul %97, %98, %cst_26 {dimension_numbers = #tpu.dot_dimension_numbers<[1], [0], [0], [1], [0, 0, 1, 1], [], []>, precision = #tpu.contract_precision<fp32>} : vector<8x64xf32>, vector<64x256xf32>, vector<8x256xf32> -> vector<8x256xf32>
    %100 = vector.extract_strided_slice %99 {offsets = [0, 0], sizes = [4, 256], strides = [1, 1]} : vector<8x256xf32> to vector<4x256xf32>
    %101 = vector.extract_strided_slice %99 {offsets = [4, 0], sizes = [4, 256], strides = [1, 1]} : vector<8x256xf32> to vector<4x256xf32>
    %c0_27 = arith.constant 0 : index
    %c0_28 = arith.constant 0 : index
    %102 = vector.load %arg2[%c0_27, %c0_28] : memref<4x8xf32, #tpu.memory_space<vmem>>, vector<4x8xf32>
    %cst_29 = arith.constant dense<0.000000e+00> : vector<4x256xf32>
    %103 = tpu.matmul %102, %1, %cst_29 {dimension_numbers = #tpu.dot_dimension_numbers<[1], [0], [0], [1], [0, 0, 1, 1], [], []>, precision = #tpu.contract_precision<fp32>} : vector<4x8xf32>, vector<8x256xf32>, vector<4x256xf32> -> vector<4x256xf32>
    %c0_30 = arith.constant 0 : index
    %c0_31 = arith.constant 0 : index
    %104 = vector.load %arg3[%c0_30, %c0_31] : memref<4x1xf32, #tpu.memory_space<vmem>>, vector<4x1xf32>
    %105 = vector.broadcast %104 : vector<4x1xf32> to vector<4x256xf32>
    %106 = arith.addf %103, %105 : vector<4x256xf32>
    %cst_32 = arith.constant 0.000000e+00 : f32
    %107 = vector.broadcast %cst_32 : f32 to vector<4x256xf32>
    %108 = arith.maximumf %106, %107 : vector<4x256xf32>
    %c0_33 = arith.constant 0 : index
    %c0_34 = arith.constant 0 : index
    %109 = vector.load %arg4[%c0_33, %c0_34] : memref<4x9xf32, #tpu.memory_space<vmem>>, vector<4x9xf32>
    %c0_35 = arith.constant 0 : index
    %c0_36 = arith.constant 0 : index
    %110 = vector.load %arg19[%c0_35, %c0_36] : memref<9x256xf32, #tpu.memory_space<vmem>>, vector<9x256xf32>
    %111 = vector.extract_strided_slice %109 {offsets = [0, 4], sizes = [4, 1], strides = [1, 1]} : vector<4x9xf32> to vector<4x1xf32>
    %112 = vector.broadcast %111 : vector<4x1xf32> to vector<4x256xf32>
    %113 = arith.mulf %108, %112 : vector<4x256xf32>
    %c17_i32 = arith.constant 17 : i32
    %114 = tpu.dynamic_rotate %108 by %c17_i32 dim 1 : vector<4x256xf32>, i32 -> vector<4x256xf32>
    %115 = vector.extract_strided_slice %110 {offsets = [0, 0], sizes = [1, 256], strides = [1, 1]} : vector<9x256xf32> to vector<1x256xf32>
    %116 = vector.broadcast %115 : vector<1x256xf32> to vector<4x256xf32>
    %117 = arith.mulf %114, %116 : vector<4x256xf32>
    %118 = vector.extract_strided_slice %109 {offsets = [0, 0], sizes = [4, 1], strides = [1, 1]} : vector<4x9xf32> to vector<4x1xf32>
    %119 = vector.broadcast %118 : vector<4x1xf32> to vector<4x256xf32>
    %120 = arith.mulf %117, %119 : vector<4x256xf32>
    %121 = arith.addf %113, %120 : vector<4x256xf32>
    %c16_i32 = arith.constant 16 : i32
    %122 = tpu.dynamic_rotate %108 by %c16_i32 dim 1 : vector<4x256xf32>, i32 -> vector<4x256xf32>
    %123 = vector.extract_strided_slice %110 {offsets = [1, 0], sizes = [1, 256], strides = [1, 1]} : vector<9x256xf32> to vector<1x256xf32>
    %124 = vector.broadcast %123 : vector<1x256xf32> to vector<4x256xf32>
    %125 = arith.mulf %122, %124 : vector<4x256xf32>
    %126 = vector.extract_strided_slice %109 {offsets = [0, 1], sizes = [4, 1], strides = [1, 1]} : vector<4x9xf32> to vector<4x1xf32>
    %127 = vector.broadcast %126 : vector<4x1xf32> to vector<4x256xf32>
    %128 = arith.mulf %125, %127 : vector<4x256xf32>
    %129 = arith.addf %121, %128 : vector<4x256xf32>
    %c15_i32 = arith.constant 15 : i32
    %130 = tpu.dynamic_rotate %108 by %c15_i32 dim 1 : vector<4x256xf32>, i32 -> vector<4x256xf32>
    %131 = vector.extract_strided_slice %110 {offsets = [2, 0], sizes = [1, 256], strides = [1, 1]} : vector<9x256xf32> to vector<1x256xf32>
    %132 = vector.broadcast %131 : vector<1x256xf32> to vector<4x256xf32>
    %133 = arith.mulf %130, %132 : vector<4x256xf32>
    %134 = vector.extract_strided_slice %109 {offsets = [0, 2], sizes = [4, 1], strides = [1, 1]} : vector<4x9xf32> to vector<4x1xf32>
    %135 = vector.broadcast %134 : vector<4x1xf32> to vector<4x256xf32>
    %136 = arith.mulf %133, %135 : vector<4x256xf32>
    %137 = arith.addf %129, %136 : vector<4x256xf32>
    %c1_i32 = arith.constant 1 : i32
    %138 = tpu.dynamic_rotate %108 by %c1_i32 dim 1 : vector<4x256xf32>, i32 -> vector<4x256xf32>
    %139 = vector.extract_strided_slice %110 {offsets = [3, 0], sizes = [1, 256], strides = [1, 1]} : vector<9x256xf32> to vector<1x256xf32>
    %140 = vector.broadcast %139 : vector<1x256xf32> to vector<4x256xf32>
    %141 = arith.mulf %138, %140 : vector<4x256xf32>
    %142 = vector.extract_strided_slice %109 {offsets = [0, 3], sizes = [4, 1], strides = [1, 1]} : vector<4x9xf32> to vector<4x1xf32>
    %143 = vector.broadcast %142 : vector<4x1xf32> to vector<4x256xf32>
    %144 = arith.mulf %141, %143 : vector<4x256xf32>
    %145 = arith.addf %137, %144 : vector<4x256xf32>
    %c255_i32 = arith.constant 255 : i32
    %146 = tpu.dynamic_rotate %108 by %c255_i32 dim 1 : vector<4x256xf32>, i32 -> vector<4x256xf32>
    %147 = vector.extract_strided_slice %110 {offsets = [5, 0], sizes = [1, 256], strides = [1, 1]} : vector<9x256xf32> to vector<1x256xf32>
    %148 = vector.broadcast %147 : vector<1x256xf32> to vector<4x256xf32>
    %149 = arith.mulf %146, %148 : vector<4x256xf32>
    %150 = vector.extract_strided_slice %109 {offsets = [0, 5], sizes = [4, 1], strides = [1, 1]} : vector<4x9xf32> to vector<4x1xf32>
    %151 = vector.broadcast %150 : vector<4x1xf32> to vector<4x256xf32>
    %152 = arith.mulf %149, %151 : vector<4x256xf32>
    %153 = arith.addf %145, %152 : vector<4x256xf32>
    %c241_i32 = arith.constant 241 : i32
    %154 = tpu.dynamic_rotate %108 by %c241_i32 dim 1 : vector<4x256xf32>, i32 -> vector<4x256xf32>
    %155 = vector.extract_strided_slice %110 {offsets = [6, 0], sizes = [1, 256], strides = [1, 1]} : vector<9x256xf32> to vector<1x256xf32>
    %156 = vector.broadcast %155 : vector<1x256xf32> to vector<4x256xf32>
    %157 = arith.mulf %154, %156 : vector<4x256xf32>
    %158 = vector.extract_strided_slice %109 {offsets = [0, 6], sizes = [4, 1], strides = [1, 1]} : vector<4x9xf32> to vector<4x1xf32>
    %159 = vector.broadcast %158 : vector<4x1xf32> to vector<4x256xf32>
    %160 = arith.mulf %157, %159 : vector<4x256xf32>
    %161 = arith.addf %153, %160 : vector<4x256xf32>
    %c240_i32 = arith.constant 240 : i32
    %162 = tpu.dynamic_rotate %108 by %c240_i32 dim 1 : vector<4x256xf32>, i32 -> vector<4x256xf32>
    %163 = vector.extract_strided_slice %110 {offsets = [7, 0], sizes = [1, 256], strides = [1, 1]} : vector<9x256xf32> to vector<1x256xf32>
    %164 = vector.broadcast %163 : vector<1x256xf32> to vector<4x256xf32>
    %165 = arith.mulf %162, %164 : vector<4x256xf32>
    %166 = vector.extract_strided_slice %109 {offsets = [0, 7], sizes = [4, 1], strides = [1, 1]} : vector<4x9xf32> to vector<4x1xf32>
    %167 = vector.broadcast %166 : vector<4x1xf32> to vector<4x256xf32>
    %168 = arith.mulf %165, %167 : vector<4x256xf32>
    %169 = arith.addf %161, %168 : vector<4x256xf32>
    %c239_i32 = arith.constant 239 : i32
    %170 = tpu.dynamic_rotate %108 by %c239_i32 dim 1 : vector<4x256xf32>, i32 -> vector<4x256xf32>
    %171 = vector.extract_strided_slice %110 {offsets = [8, 0], sizes = [1, 256], strides = [1, 1]} : vector<9x256xf32> to vector<1x256xf32>
    %172 = vector.broadcast %171 : vector<1x256xf32> to vector<4x256xf32>
    %173 = arith.mulf %170, %172 : vector<4x256xf32>
    %174 = vector.extract_strided_slice %109 {offsets = [0, 8], sizes = [4, 1], strides = [1, 1]} : vector<4x9xf32> to vector<4x1xf32>
    %175 = vector.broadcast %174 : vector<4x1xf32> to vector<4x256xf32>
    %176 = arith.mulf %173, %175 : vector<4x256xf32>
    %177 = arith.addf %169, %176 : vector<4x256xf32>
    %c0_37 = arith.constant 0 : index
    %c0_38 = arith.constant 0 : index
    %178 = vector.load %arg5[%c0_37, %c0_38] : memref<4x1xf32, #tpu.memory_space<vmem>>, vector<4x1xf32>
    %179 = vector.broadcast %178 : vector<4x1xf32> to vector<4x256xf32>
    %180 = arith.addf %177, %179 : vector<4x256xf32>
    %cst_39 = arith.constant 0.000000e+00 : f32
    %181 = vector.broadcast %cst_39 : f32 to vector<4x256xf32>
    %182 = arith.maximumf %180, %181 : vector<4x256xf32>
    %183 = arith.mulf %108, %100 : vector<4x256xf32>
    %184 = arith.mulf %182, %101 : vector<4x256xf32>
    %c0_40 = arith.constant 0 : index
    %c0_41 = arith.constant 0 : index
    %185 = vector.load %arg12[%c0_40, %c0_41] : memref<4x4xf32, #tpu.memory_space<vmem>>, vector<4x4xf32>
    %cst_42 = arith.constant dense<0.000000e+00> : vector<4x256xf32>
    %186 = tpu.matmul %185, %183, %cst_42 {dimension_numbers = #tpu.dot_dimension_numbers<[1], [0], [0], [1], [0, 0, 1, 1], [], []>, precision = #tpu.contract_precision<fp32>} : vector<4x4xf32>, vector<4x256xf32>, vector<4x256xf32> -> vector<4x256xf32>
    %c0_43 = arith.constant 0 : index
    %c0_44 = arith.constant 0 : index
    %187 = vector.load %arg13[%c0_43, %c0_44] : memref<4x4xf32, #tpu.memory_space<vmem>>, vector<4x4xf32>
    %cst_45 = arith.constant dense<0.000000e+00> : vector<4x256xf32>
    %188 = tpu.matmul %187, %184, %cst_45 {dimension_numbers = #tpu.dot_dimension_numbers<[1], [0], [0], [1], [0, 0, 1, 1], [], []>, precision = #tpu.contract_precision<fp32>} : vector<4x4xf32>, vector<4x256xf32>, vector<4x256xf32> -> vector<4x256xf32>
    %189 = arith.addf %186, %188 : vector<4x256xf32>
    %c0_46 = arith.constant 0 : index
    %c0_47 = arith.constant 0 : index
    %190 = vector.load %arg14[%c0_46, %c0_47] : memref<4x1xf32, #tpu.memory_space<vmem>>, vector<4x1xf32>
    %191 = vector.broadcast %190 : vector<4x1xf32> to vector<4x256xf32>
    %192 = arith.addf %189, %191 : vector<4x256xf32>
    %c0_48 = arith.constant 0 : index
    %c0_49 = arith.constant 0 : index
    %193 = vector.load %arg15[%c0_48, %c0_49] : memref<4x9xf32, #tpu.memory_space<vmem>>, vector<4x9xf32>
    %c0_50 = arith.constant 0 : index
    %c0_51 = arith.constant 0 : index
    %194 = vector.load %arg19[%c0_50, %c0_51] : memref<9x256xf32, #tpu.memory_space<vmem>>, vector<9x256xf32>
    %195 = vector.extract_strided_slice %193 {offsets = [0, 4], sizes = [4, 1], strides = [1, 1]} : vector<4x9xf32> to vector<4x1xf32>
    %196 = vector.broadcast %195 : vector<4x1xf32> to vector<4x256xf32>
    %197 = arith.mulf %192, %196 : vector<4x256xf32>
    %c17_i32_52 = arith.constant 17 : i32
    %198 = tpu.dynamic_rotate %192 by %c17_i32_52 dim 1 : vector<4x256xf32>, i32 -> vector<4x256xf32>
    %199 = vector.extract_strided_slice %194 {offsets = [0, 0], sizes = [1, 256], strides = [1, 1]} : vector<9x256xf32> to vector<1x256xf32>
    %200 = vector.broadcast %199 : vector<1x256xf32> to vector<4x256xf32>
    %201 = arith.mulf %198, %200 : vector<4x256xf32>
    %202 = vector.extract_strided_slice %193 {offsets = [0, 0], sizes = [4, 1], strides = [1, 1]} : vector<4x9xf32> to vector<4x1xf32>
    %203 = vector.broadcast %202 : vector<4x1xf32> to vector<4x256xf32>
    %204 = arith.mulf %201, %203 : vector<4x256xf32>
    %205 = arith.addf %197, %204 : vector<4x256xf32>
    %c16_i32_53 = arith.constant 16 : i32
    %206 = tpu.dynamic_rotate %192 by %c16_i32_53 dim 1 : vector<4x256xf32>, i32 -> vector<4x256xf32>
    %207 = vector.extract_strided_slice %194 {offsets = [1, 0], sizes = [1, 256], strides = [1, 1]} : vector<9x256xf32> to vector<1x256xf32>
    %208 = vector.broadcast %207 : vector<1x256xf32> to vector<4x256xf32>
    %209 = arith.mulf %206, %208 : vector<4x256xf32>
    %210 = vector.extract_strided_slice %193 {offsets = [0, 1], sizes = [4, 1], strides = [1, 1]} : vector<4x9xf32> to vector<4x1xf32>
    %211 = vector.broadcast %210 : vector<4x1xf32> to vector<4x256xf32>
    %212 = arith.mulf %209, %211 : vector<4x256xf32>
    %213 = arith.addf %205, %212 : vector<4x256xf32>
    %c15_i32_54 = arith.constant 15 : i32
    %214 = tpu.dynamic_rotate %192 by %c15_i32_54 dim 1 : vector<4x256xf32>, i32 -> vector<4x256xf32>
    %215 = vector.extract_strided_slice %194 {offsets = [2, 0], sizes = [1, 256], strides = [1, 1]} : vector<9x256xf32> to vector<1x256xf32>
    %216 = vector.broadcast %215 : vector<1x256xf32> to vector<4x256xf32>
    %217 = arith.mulf %214, %216 : vector<4x256xf32>
    %218 = vector.extract_strided_slice %193 {offsets = [0, 2], sizes = [4, 1], strides = [1, 1]} : vector<4x9xf32> to vector<4x1xf32>
    %219 = vector.broadcast %218 : vector<4x1xf32> to vector<4x256xf32>
    %220 = arith.mulf %217, %219 : vector<4x256xf32>
    %221 = arith.addf %213, %220 : vector<4x256xf32>
    %c1_i32_55 = arith.constant 1 : i32
    %222 = tpu.dynamic_rotate %192 by %c1_i32_55 dim 1 : vector<4x256xf32>, i32 -> vector<4x256xf32>
    %223 = vector.extract_strided_slice %194 {offsets = [3, 0], sizes = [1, 256], strides = [1, 1]} : vector<9x256xf32> to vector<1x256xf32>
    %224 = vector.broadcast %223 : vector<1x256xf32> to vector<4x256xf32>
    %225 = arith.mulf %222, %224 : vector<4x256xf32>
    %226 = vector.extract_strided_slice %193 {offsets = [0, 3], sizes = [4, 1], strides = [1, 1]} : vector<4x9xf32> to vector<4x1xf32>
    %227 = vector.broadcast %226 : vector<4x1xf32> to vector<4x256xf32>
    %228 = arith.mulf %225, %227 : vector<4x256xf32>
    %229 = arith.addf %221, %228 : vector<4x256xf32>
    %c255_i32_56 = arith.constant 255 : i32
    %230 = tpu.dynamic_rotate %192 by %c255_i32_56 dim 1 : vector<4x256xf32>, i32 -> vector<4x256xf32>
    %231 = vector.extract_strided_slice %194 {offsets = [5, 0], sizes = [1, 256], strides = [1, 1]} : vector<9x256xf32> to vector<1x256xf32>
    %232 = vector.broadcast %231 : vector<1x256xf32> to vector<4x256xf32>
    %233 = arith.mulf %230, %232 : vector<4x256xf32>
    %234 = vector.extract_strided_slice %193 {offsets = [0, 5], sizes = [4, 1], strides = [1, 1]} : vector<4x9xf32> to vector<4x1xf32>
    %235 = vector.broadcast %234 : vector<4x1xf32> to vector<4x256xf32>
    %236 = arith.mulf %233, %235 : vector<4x256xf32>
    %237 = arith.addf %229, %236 : vector<4x256xf32>
    %c241_i32_57 = arith.constant 241 : i32
    %238 = tpu.dynamic_rotate %192 by %c241_i32_57 dim 1 : vector<4x256xf32>, i32 -> vector<4x256xf32>
    %239 = vector.extract_strided_slice %194 {offsets = [6, 0], sizes = [1, 256], strides = [1, 1]} : vector<9x256xf32> to vector<1x256xf32>
    %240 = vector.broadcast %239 : vector<1x256xf32> to vector<4x256xf32>
    %241 = arith.mulf %238, %240 : vector<4x256xf32>
    %242 = vector.extract_strided_slice %193 {offsets = [0, 6], sizes = [4, 1], strides = [1, 1]} : vector<4x9xf32> to vector<4x1xf32>
    %243 = vector.broadcast %242 : vector<4x1xf32> to vector<4x256xf32>
    %244 = arith.mulf %241, %243 : vector<4x256xf32>
    %245 = arith.addf %237, %244 : vector<4x256xf32>
    %c240_i32_58 = arith.constant 240 : i32
    %246 = tpu.dynamic_rotate %192 by %c240_i32_58 dim 1 : vector<4x256xf32>, i32 -> vector<4x256xf32>
    %247 = vector.extract_strided_slice %194 {offsets = [7, 0], sizes = [1, 256], strides = [1, 1]} : vector<9x256xf32> to vector<1x256xf32>
    %248 = vector.broadcast %247 : vector<1x256xf32> to vector<4x256xf32>
    %249 = arith.mulf %246, %248 : vector<4x256xf32>
    %250 = vector.extract_strided_slice %193 {offsets = [0, 7], sizes = [4, 1], strides = [1, 1]} : vector<4x9xf32> to vector<4x1xf32>
    %251 = vector.broadcast %250 : vector<4x1xf32> to vector<4x256xf32>
    %252 = arith.mulf %249, %251 : vector<4x256xf32>
    %253 = arith.addf %245, %252 : vector<4x256xf32>
    %c239_i32_59 = arith.constant 239 : i32
    %254 = tpu.dynamic_rotate %192 by %c239_i32_59 dim 1 : vector<4x256xf32>, i32 -> vector<4x256xf32>
    %255 = vector.extract_strided_slice %194 {offsets = [8, 0], sizes = [1, 256], strides = [1, 1]} : vector<9x256xf32> to vector<1x256xf32>
    %256 = vector.broadcast %255 : vector<1x256xf32> to vector<4x256xf32>
    %257 = arith.mulf %254, %256 : vector<4x256xf32>
    %258 = vector.extract_strided_slice %193 {offsets = [0, 8], sizes = [4, 1], strides = [1, 1]} : vector<4x9xf32> to vector<4x1xf32>
    %259 = vector.broadcast %258 : vector<4x1xf32> to vector<4x256xf32>
    %260 = arith.mulf %257, %259 : vector<4x256xf32>
    %261 = arith.addf %253, %260 : vector<4x256xf32>
    %c0_60 = arith.constant 0 : index
    %c0_61 = arith.constant 0 : index
    %262 = vector.load %arg16[%c0_60, %c0_61] : memref<4x1xf32, #tpu.memory_space<vmem>>, vector<4x1xf32>
    %263 = vector.broadcast %262 : vector<4x1xf32> to vector<4x256xf32>
    %264 = arith.addf %261, %263 : vector<4x256xf32>
    %265 = vector.extract_strided_slice %1 {offsets = [0, 0], sizes = [4, 256], strides = [1, 1]} : vector<8x256xf32> to vector<4x256xf32>
    %266 = arith.addf %265, %192 : vector<4x256xf32>
    %c0_62 = arith.constant 0 : index
    %c0_63 = arith.constant 0 : index
    %c0_64 = arith.constant 0 : index
    %267 = vector.load %arg22[%c0_62, %c0_63, %c0_64] : memref<1x8x256xf32, #tpu.memory_space<vmem>>, vector<1x4x256xf32>
    %268 = vector.shape_cast %267 : vector<1x4x256xf32> to vector<4x256xf32>
    %269 = vector.shape_cast %266 : vector<4x256xf32> to vector<1x4x256xf32>
    tpu.vector_store %arg22[%c0_62, %c0_63, %c0_64], %269 {strides = array<i32>} : memref<1x8x256xf32, #tpu.memory_space<vmem>>, vector<1x4x256xf32>,
    %270 = vector.extract_strided_slice %1 {offsets = [4, 0], sizes = [4, 256], strides = [1, 1]} : vector<8x256xf32> to vector<4x256xf32>
    %271 = arith.addf %270, %264 : vector<4x256xf32>
    %c0_65 = arith.constant 0 : index
    %c4 = arith.constant 4 : index
    %c0_66 = arith.constant 0 : index
    %272 = vector.load %arg22[%c0_65, %c4, %c0_66] : memref<1x8x256xf32, #tpu.memory_space<vmem>>, vector<1x4x256xf32>
    %273 = vector.shape_cast %272 : vector<1x4x256xf32> to vector<4x256xf32>
    %274 = vector.shape_cast %271 : vector<4x256xf32> to vector<1x4x256xf32>
    tpu.vector_store %arg22[%c0_65, %c4, %c0_66], %274 {strides = array<i32>} : memref<1x8x256xf32, #tpu.memory_space<vmem>>, vector<1x4x256xf32>,
    return
  }
  func.func @transform_0(%arg0: i32) -> (i32, i32, i32) {
    %c0_i32 = arith.constant 0 : i32
    %c0_i32_0 = arith.constant 0 : i32
    %c0_i32_1 = arith.constant 0 : i32
    return %arg0, %c0_i32, %c0_i32_0 : i32, i32, i32
  }
  func.func @transform_1(%arg0: i32) -> (i32, i32) {
    %c0_i32 = arith.constant 0 : i32
    %c0_i32_0 = arith.constant 0 : i32
    %c0_i32_1 = arith.constant 0 : i32
    return %c0_i32, %c0_i32_0 : i32, i32
  }
  func.func @transform_2(%arg0: i32) -> (i32, i32) {
    %c0_i32 = arith.constant 0 : i32
    %c0_i32_0 = arith.constant 0 : i32
    %c0_i32_1 = arith.constant 0 : i32
    return %c0_i32, %c0_i32_0 : i32, i32
  }
  func.func @transform_3(%arg0: i32) -> (i32, i32) {
    %c0_i32 = arith.constant 0 : i32
    %c0_i32_0 = arith.constant 0 : i32
    %c0_i32_1 = arith.constant 0 : i32
    return %c0_i32, %c0_i32_0 : i32, i32
  }
  func.func @transform_4(%arg0: i32) -> (i32, i32) {
    %c0_i32 = arith.constant 0 : i32
    %c0_i32_0 = arith.constant 0 : i32
    %c0_i32_1 = arith.constant 0 : i32
    return %c0_i32, %c0_i32_0 : i32, i32
  }
  func.func @transform_5(%arg0: i32) -> (i32, i32) {
    %c0_i32 = arith.constant 0 : i32
    %c0_i32_0 = arith.constant 0 : i32
    %c0_i32_1 = arith.constant 0 : i32
    return %c0_i32, %c0_i32_0 : i32, i32
  }
  func.func @transform_6(%arg0: i32) -> (i32, i32) {
    %c0_i32 = arith.constant 0 : i32
    %c0_i32_0 = arith.constant 0 : i32
    %c0_i32_1 = arith.constant 0 : i32
    return %c0_i32, %c0_i32_0 : i32, i32
  }
  func.func @transform_7(%arg0: i32) -> (i32, i32) {
    %c0_i32 = arith.constant 0 : i32
    %c0_i32_0 = arith.constant 0 : i32
    %c0_i32_1 = arith.constant 0 : i32
    return %c0_i32, %c0_i32_0 : i32, i32
  }
  func.func @transform_8(%arg0: i32) -> (i32, i32) {
    %c0_i32 = arith.constant 0 : i32
    %c0_i32_0 = arith.constant 0 : i32
    %c0_i32_1 = arith.constant 0 : i32
    return %c0_i32, %c0_i32_0 : i32, i32
  }
  func.func @transform_9(%arg0: i32) -> (i32, i32) {
    %c0_i32 = arith.constant 0 : i32
    %c0_i32_0 = arith.constant 0 : i32
    %c0_i32_1 = arith.constant 0 : i32
    return %c0_i32, %c0_i32_0 : i32, i32
  }
  func.func @transform_10(%arg0: i32) -> (i32, i32) {
    %c0_i32 = arith.constant 0 : i32
    %c0_i32_0 = arith.constant 0 : i32
    %c0_i32_1 = arith.constant 0 : i32
    return %c0_i32, %c0_i32_0 : i32, i32
  }
  func.func @transform_11(%arg0: i32) -> (i32, i32) {
    %c0_i32 = arith.constant 0 : i32
    %c0_i32_0 = arith.constant 0 : i32
    %c0_i32_1 = arith.constant 0 : i32
    return %c0_i32, %c0_i32_0 : i32, i32
  }
  func.func @transform_12(%arg0: i32) -> (i32, i32) {
    %c0_i32 = arith.constant 0 : i32
    %c0_i32_0 = arith.constant 0 : i32
    %c0_i32_1 = arith.constant 0 : i32
    return %c0_i32, %c0_i32_0 : i32, i32
  }
  func.func @transform_13(%arg0: i32) -> (i32, i32) {
    %c0_i32 = arith.constant 0 : i32
    %c0_i32_0 = arith.constant 0 : i32
    %c0_i32_1 = arith.constant 0 : i32
    return %c0_i32, %c0_i32_0 : i32, i32
  }
  func.func @transform_14(%arg0: i32) -> (i32, i32) {
    %c0_i32 = arith.constant 0 : i32
    %c0_i32_0 = arith.constant 0 : i32
    %c0_i32_1 = arith.constant 0 : i32
    return %c0_i32, %c0_i32_0 : i32, i32
  }
  func.func @transform_15(%arg0: i32) -> (i32, i32) {
    %c0_i32 = arith.constant 0 : i32
    %c0_i32_0 = arith.constant 0 : i32
    %c0_i32_1 = arith.constant 0 : i32
    return %c0_i32, %c0_i32_0 : i32, i32
  }
  func.func @transform_16(%arg0: i32) -> (i32, i32) {
    %c0_i32 = arith.constant 0 : i32
    %c0_i32_0 = arith.constant 0 : i32
    %c0_i32_1 = arith.constant 0 : i32
    return %c0_i32, %c0_i32_0 : i32, i32
  }
  func.func @transform_17(%arg0: i32) -> (i32, i32) {
    %c0_i32 = arith.constant 0 : i32
    %c0_i32_0 = arith.constant 0 : i32
    %c0_i32_1 = arith.constant 0 : i32
    return %c0_i32, %c0_i32_0 : i32, i32
  }
  func.func @transform_18(%arg0: i32) -> (i32, i32) {
    %c0_i32 = arith.constant 0 : i32
    %c0_i32_0 = arith.constant 0 : i32
    %c0_i32_1 = arith.constant 0 : i32
    return %c0_i32, %c0_i32_0 : i32, i32
  }
  func.func @transform_19(%arg0: i32) -> (i32, i32) {
    %c0_i32 = arith.constant 0 : i32
    %c0_i32_0 = arith.constant 0 : i32
    %c0_i32_1 = arith.constant 0 : i32
    return %c0_i32, %c0_i32_0 : i32, i32
  }
  func.func @transform_20(%arg0: i32) -> (i32, i32) {
    %c0_i32 = arith.constant 0 : i32
    %c0_i32_0 = arith.constant 0 : i32
    %c0_i32_1 = arith.constant 0 : i32
    return %c0_i32, %c0_i32_0 : i32, i32
  }
  func.func @transform_21(%arg0: i32) -> (i32, i32, i32) {
    %c0_i32 = arith.constant 0 : i32
    %c0_i32_0 = arith.constant 0 : i32
    %c0_i32_1 = arith.constant 0 : i32
    return %arg0, %c0_i32, %c0_i32_0 : i32, i32, i32
  }
}

</mosaic_0001>

<bundles_post_ra>
// kernel: ghostblockv2_pallas.1
= control target key start
LH: loop header
LB: loop body
LE: loop exit
PB: predicated region body
PF: predicated region fallthrough
CT: control target
= control target key end

     0   :  { %s5139_s0 = inlined_call_operand.vmem [shape: f32[2,8,256], index: 0, kind: input, shape index: {}, may-alias: {0,21}]   ;;  %s5140_s1 = inlined_call_operand.vmem [shape: f32[4,8], index: 1, kind: input, shape index: {}]   ;;  %s5141_s2 = inlined_call_operand.vmem [shape: f32[4,1], index: 2, kind: input, shape index: {}]   ;;  %s5142_s3 = inlined_call_operand.vmem [shape: f32[4,9], index: 3, kind: input, shape index: {}]   ;;  %s5143_s4 = inlined_call_operand.vmem [shape: f32[4,1], index: 4, kind: input, shape index: {}]   ;;  %s5144_s5 = inlined_call_operand.vmem [shape: f32[8,8], index: 5, kind: input, shape index: {}]   ;;  %s5145_s6 = inlined_call_operand.vmem [shape: f32[8,1], index: 6, kind: input, shape index: {}]   ;;  %s5146_s7 = inlined_call_operand.vmem [shape: f32[8,5], index: 7, kind: input, shape index: {}]   ;;  %s5147_s8 = inlined_call_operand.vmem [shape: f32[8,1], index: 8, kind: input, shape index: {}]   ;;  %s5148_s9 = inlined_call_operand.vmem [shape: f32[8,5], index: 9, kind: input, shape index: {}]   ;;  %s5149_s10 = inlined_call_operand.vmem [shape: f32[8,1], index: 10, kind: input, shape index: {}]   ;;  %s5150_s11 = inlined_call_operand.vmem [shape: f32[4,4], index: 11, kind: input, shape index: {}]   ;;  %s5151_s12 = inlined_call_operand.vmem [shape: f32[4,4], index: 12, kind: input, shape index: {}]   ;;  %s5152_s13 = inlined_call_operand.vmem [shape: f32[4,1], index: 13, kind: input, shape index: {}]   ;;  %s5153_s14 = inlined_call_operand.vmem [shape: f32[4,9], index: 14, kind: input, shape index: {}]   ;;  %s5154_s15 = inlined_call_operand.vmem [shape: f32[4,1], index: 15, kind: input, shape index: {}]   ;;  %s5155_s16 = inlined_call_operand.vmem [shape: f32[256,64], index: 16, kind: input, shape index: {}]   ;;  %s5156_s17 = inlined_call_operand.vmem [shape: f32[64,256], index: 17, kind: input, shape index: {}]   ;;  %s5157_s18 = inlined_call_operand.vmem [shape: f32[9,256], index: 18, kind: input, shape index: {}]   ;;  %s5158_s19 = inlined_call_operand.vmem [shape: f32[5,64], index: 19, kind: input, shape index: {}]   ;;  %s5159_s20 = inlined_call_operand.vmem [shape: f32[5,64], index: 20, kind: input, shape index: {}]   ;;  %s5160_s21 = inlined_call_operand.vmem [shape: f32[2,8,256], index: 21, kind: output, shape index: {}, may-alias: {0,21}]  }
   0x1   :  { %5187 = sst [smem:[#allocation3_spill]] %s5139_s0 }
   0x2   :  { %5188 = sst [smem:[#allocation4_spill]] %s5140_s1 }
   0x3   :  { %5189 = sst [smem:[#allocation5_spill]] %s5141_s2  ;;  %s3754_s2 = smov 0  }
   0x4   :  { %5190 = sst [smem:[#allocation6_spill]] %s5142_s3 }
   0x5   :  { %5191 = sst [smem:[#allocation7_spill]] %s5143_s4 }
   0x6   :  { %5192 = sst [smem:[#allocation8_spill]] %s5144_s5 }
   0x7 LB: > { %s3518_s25 = sadd.s32 4294967295, %s3614_s2   ;;  %p3522_p0 = scmp.ge.s32.totalorder %s3614_s2, 1  ;;  %s3614_s2 = sphi %s3754_s2, %s31_s2  }
   0x8   : > { %p587_p1 = scmp.lt.s32.totalorder %s3614_s2, 3 }
   0xa   : > { %p588_p2 = pnand %p3522_p0, %p587_p1 }
   0xc   : > { %591 = sbr.rel (%p588_p2) target bundleno = 1636 (0x664), region = 104 }
  0x11   : > { %v674_v0 = vld [vmem:[%s5155_s16 + $0x78] sm:$0xff]  ;;  %v673_v1 = vld [vmem:[%s5155_s16 + $0x70] sm:$0xff]  ;;  %v672_v2 = vld [vmem:[%s5155_s16 + $0x68] sm:$0xff]  ;;  %p4027_p3 = scmp.lt.s32.totalorder %s3518_s25, 1  ;;  %s5197_s5 = sld [smem:[#allocation3_spill]]  ;;  %vm1380_vm0 = vcmask 64512  }
  0x12   : > { %v3771_v3 = vand.u32 4294901760, %v674_v0  ;;  %v3773_v4 = vand.u32 4294901760, %v673_v1  ;;  %v3775_v5 = vand.u32 4294901760, %v672_v2  ;;  %v671_v6 = vld [vmem:[%s5155_s16 + $0x60] sm:$0xff]  ;;  %v670_v7 = vld [vmem:[%s5155_s16 + $0x58] sm:$0xff]  ;;  %v669_v8 = vld [vmem:[%s5155_s16 + $0x50] sm:$0xff] }
  0x13   : > { %v3786_v9 = vand.u32 4294901760, %v671_v6  ;;  %v3788_v10 = vand.u32 4294901760, %v670_v7  ;;  %v3790_v11 = vand.u32 4294901760, %v669_v8  ;;  %v668_v12 = vld [vmem:[%s5155_s16 + $0x48] sm:$0xff]  ;;  %v667_v13 = vld [vmem:[%s5155_s16 + $0x40] sm:$0xff]  ;;  %v666_v18 = vld [vmem:[%s5155_s16 + $0x38] sm:$0xff] }
  0x14   : > { %692 = vmatpush.msra.mxu0 %v3771_v3  ;;  %v3800_v14 = vsub.f32 %v674_v0, %v3771_v3  ;;  %v3803_v15 = vsub.f32 %v673_v1, %v3773_v4  ;;  %888 = vmatpush.msra.mxu3 %v3771_v3  ;;  %v3807_v16 = vsub.f32 %v672_v2, %v3775_v5  ;;  %v3809_v17 = vand.u32 4294901760, %v668_v12  ;;  %v665_v26 = vld [vmem:[%s5155_s16 + $0x30] sm:$0xff]  ;;  %v664_v34 = vld [vmem:[%s5155_s16 + $0x28] sm:$0xff]  ;;  %v663_v42 = vld [vmem:[%s5155_s16 + $0x20] sm:$0xff]  ;;  %s5232_s25 = smov (!%p4027_p3, %s3518_s25), 1  ;;  %s3618_s27 = smov 3  }
  0x15   : > { %v3815_v19 = vsub.f32 %v671_v6, %v3786_v9  ;;  %v3818_v20 = vsub.f32 %v670_v7, %v3788_v10  ;;  %v3821_v21 = vsub.f32 %v669_v8, %v3790_v11  ;;  %v3828_v25 = vand.u32 4294901760, %v667_v13  ;;  %v662_v48 = vld [vmem:[%s5155_s16 + $0x18] sm:$0xff]  ;;  %v661_v54 = vld [vmem:[%s5155_s16 + $0x10] sm:$0xff]  ;;  %v660_v61 = vld [vmem:[%s5155_s16 + $0x8] sm:$0xff]  ;;  %s3530_s28 = sshll.u32 %s5232_s25, 4  ;;  %s3620_s0 = smov 1  }
  0x16   : > { %694 = vmatpush.msra.mxu0 %v3773_v4  ;;  %835 = vmatpush.msra.mxu2 %v3800_v14  ;;  %v734_v22 = vand.u32 4294901760, %v3800_v14  ;;  %v5176_v23 = vand.u32 4294901760, %v3803_v15  ;;  %v5175_v24 = vand.u32 4294901760, %v3807_v16  ;;  %v3835_v28 = vand.u32 4294901760, %v666_v18  ;;  %v690_v59 = vld [vmem:[%s5155_s16 + $0xf8] sm:$0xff]  ;;  %v659_v2 = vld [vmem:[%s5155_s16] sm:$0xff] }
  0x17   : > { %890 = vmatpush.msra.mxu3 %v3773_v4  ;;  %v5172_v27 = vand.u32 4294901760, %v3815_v19  ;;  %v3838_v29 = vsub.f32 %v668_v12, %v3809_v17  ;;  %v5170_v33 = vand.u32 4294901760, %v3818_v20  ;;  %v3856_v35 = vand.u32 4294901760, %v665_v26  ;;  %v689_v6 = vld [vmem:[%s5155_s16 + $0xf0] sm:$0xff]  ;;  %s4135_s22 = scalar_lea.vmem %s5197_s5, %s3530_s28  ;;  %s5225_s5 = sld [smem:[#allocation8_spill]] }
  0x18   : > { %696 = vmatpush.msra.mxu0 %v3775_v5  ;;  %838 = vmatpush.msra.mxu2 %v3803_v15  ;;  %v735_v30 = vsub.f32 %v3800_v14, %v734_v22  ;;  %v741_v31 = vsub.f32 %v3803_v15, %v5176_v23  ;;  %v747_v32 = vsub.f32 %v3807_v16, %v5175_v24  ;;  %v5169_v36 = vand.u32 4294901760, %v3821_v21  ;;  %s3623_s4 = smov 2   ;;  %s3624_s30 = smov 4  }
  0x19   : > { %892 = vmatpush.msra.mxu3 %v3775_v5  ;;  %v753_v39 = vsub.f32 %v3815_v19, %v5172_v27  ;;  %v3865_v40 = vsub.f32 %v667_v13, %v3828_v25  ;;  %v3868_v41 = vand.u32 4294901760, %v664_v34  ;;  %v759_v44 = vsub.f32 %v3818_v20, %v5170_v33  ;;  %s3626_s23 = smov 127   ;;  %s3627_s26 = smov 124  }
  0x1a   : > { %698 = vmatpush.msra.mxu0 %v3786_v9  ;;  %v736_v37 = vand.u32 4294901760, %v735_v30  ;;  %841 = vmatpush.msra.mxu2 %v3807_v16  ;;  %v742_v38 = vand.u32 4294901760, %v741_v31  ;;  %v748_v43 = vand.u32 4294901760, %v747_v32  ;;  %v5167_v45 = vand.u32 4294901760, %v3838_v29  ;;  %v688_v32 = vld [vmem:[%s5155_s16 + $0xe8] sm:$0xff]  ;;  %s3630_s1 = smov 24  }
  0x1b   : > { %894 = vmatpush.msra.mxu3 %v3786_v9  ;;  %v3879_v46 = vsub.f32 %v666_v18, %v3835_v28  ;;  %v765_v47 = vsub.f32 %v3821_v21, %v5169_v36  ;;  %v754_v49 = vand.u32 4294901760, %v753_v39  ;;  %v3890_v50 = vand.u32 4294901760, %v663_v42  ;;  %s3631_s24 = smov 16   ;;  %s3634_s3 = smov 96  }
  0x1c   : > { %700 = vmatpush.msra.mxu0 %v3788_v10  ;;  %737 = vmatpush.msra.mxu1 %v736_v37  ;;  %v5166_v51 = vand.u32 4294901760, %v3865_v40  ;;  %v3894_v52 = vsub.f32 %v665_v26, %v3856_v35  ;;  %v3899_v53 = vsub.f32 %v664_v34, %v3868_v41  ;;  %v760_v55 = vand.u32 4294901760, %v759_v44  ;;  %v687_v44 = vld [vmem:[%s5155_s16 + $0xe0] sm:$0xff]  ;;  %s5230_s25 = smov 111  }
  0x1d   : > { %844 = vmatpush.msra.mxu2 %v3815_v19  ;;  %896 = vmatpush.msra.mxu3 %v3788_v10  ;;  %v771_v56 = vsub.f32 %v3838_v29, %v5167_v45  ;;  %v3908_v57 = vand.u32 4294901760, %v662_v48  ;;  %v5165_v58 = vand.u32 4294901760, %v3879_v46  ;;  %v766_v60 = vand.u32 4294901760, %v765_v47  ;;  %v683_v45 = vld [vmem:[%s5155_s16 + $0xc0] sm:$0xff] }
  0x1e   : > { %702 = vmatpush.msra.mxu0 %v3790_v11  ;;  %743 = vmatpush.msra.mxu1 %v742_v38  ;;  %v777_v62 = vsub.f32 %v3865_v40, %v5166_v51  ;;  %v3923_v63 = vand.u32 4294901760, %v661_v54  ;;  %v5163_v0 = vand.u32 4294901760, %v3894_v52  ;;  %v3927_v1 = vsub.f32 %v663_v42, %v3890_v50 }
  0x1f   : > { %847 = vmatpush.msra.mxu2 %v3818_v20  ;;  %898 = vmatpush.msra.mxu3 %v3790_v11  ;;  %v5162_v7 = vand.u32 4294901760, %v3899_v53  ;;  %v3938_v8 = vand.u32 4294901760, %v690_v59  ;;  %v772_v12 = vand.u32 4294901760, %v771_v56  ;;  %v783_v13 = vsub.f32 %v3879_v46, %v5165_v58 }
  0x20   : > { %704 = vmatpush.msra.mxu0 %v3809_v17  ;;  %749 = vmatpush.msra.mxu1 %v748_v43  ;;  %v3944_v18 = vand.u32 4294901760, %v660_v61  ;;  %v3947_v26 = vsub.f32 %v662_v48, %v3908_v57  ;;  %v3951_v30 = vand.u32 4294901760, %v659_v2  ;;  %v3953_v31 = vand.u32 4294901760, %v689_v6 }
  0x21   : > { %850 = vmatpush.msra.mxu2 %v3821_v21  ;;  %900 = vmatpush.msra.mxu3 %v3809_v17  ;;  %v778_v34 = vand.u32 4294901760, %v777_v62  ;;  %v789_v37 = vsub.f32 %v3894_v52, %v5163_v0  ;;  %v5161_v38 = vand.u32 4294901760, %v3927_v1  ;;  %v3964_v39 = vsub.f32 %v661_v54, %v3923_v63 }
  0x22   : > { %706 = vmatpush.msra.mxu0 %v3828_v25  ;;  %755 = vmatpush.msra.mxu1 %v754_v49  ;;  %v795_v42 = vsub.f32 %v3899_v53, %v5162_v7  ;;  %v3972_v43 = vsub.f32 %v690_v59, %v3938_v8  ;;  %v784_v47 = vand.u32 4294901760, %v783_v13  ;;  %v5164_v48 = vand.u32 4294901760, %v3947_v26  ;;  %v686_v59 = vld [vmem:[%s5155_s16 + $0xd8] sm:$0xff]  ;;  %v685_v13 = vld [vmem:[%s5155_s16 + $0xd0] sm:$0xff]  ;;  %v684_v7 = vld [vmem:[%s5155_s16 + $0xc8] sm:$0xff] }
  0x23   : > { %853 = vmatpush.msra.mxu2 %v3838_v29  ;;  %902 = vmatpush.msra.mxu3 %v3828_v25  ;;  %v3980_v49 = vsub.f32 %v660_v61, %v3944_v18  ;;  %v3982_v54 = vand.u32 4294901760, %v688_v32  ;;  %v3990_v56 = vsub.f32 %v689_v6, %v3953_v31  ;;  %v801_v61 = vsub.f32 %v3927_v1, %v5161_v38 }
  0x24   : > { %708 = vmatpush.msra.mxu0 %v3835_v28  ;;  %761 = vmatpush.msra.mxu1 %v760_v55  ;;  %v3987_v55 = vsub.f32 %v659_v2, %v3951_v30  ;;  %v5168_v62 = vand.u32 4294901760, %v3964_v39  ;;  %v796_v2 = vand.u32 4294901760, %v795_v42  ;;  %v5171_v6 = vand.u32 4294901760, %v3972_v43 }
  0x25   : > { %856 = vmatpush.msra.mxu2 %v3865_v40  ;;  %904 = vmatpush.msra.mxu3 %v3835_v28  ;;  %5193 = vst [vmem:[#allocation2_spill] sm:$0xff] %v3982_v54  ;;  %v4014_v38 = vsub.f32 %v688_v32, %v3982_v54  ;;  %v4016_v42 = vand.u32 4294901760, %v686_v59  ;;  %v5173_v0 = vand.u32 4294901760, %v3990_v56  ;;  %v802_v32 = vand.u32 4294901760, %v801_v61 }
  0x26   : > { %710 = vmatpush.msra.mxu0 %v3856_v35  ;;  %767 = vmatpush.msra.mxu1 %v766_v60  ;;  %v790_v60 = vand.u32 4294901760, %v789_v37  ;;  %v5174_v37 = vand.u32 4294901760, %v3980_v49  ;;  %v4038_v51 = vand.u32 4294901760, %v685_v13  ;;  %v4048_v61 = vand.u32 4294901760, %v684_v7 }
  0x27   : > { %859 = vmatpush.msra.mxu2 %v3879_v46  ;;  %906 = vmatpush.msra.mxu3 %v3856_v35  ;;  %v5178_v36 = vand.u32 4294901760, %v4014_v38  ;;  %v4056_v33 = vsub.f32 %v686_v59, %v4016_v42  ;;  %v4063_v27 = vand.u32 4294901760, %v683_v45  ;;  %vm1542_vm1 = vcmask 15360  }
  0x28   : > { %712 = vmatpush.msra.mxu0 %v3868_v41  ;;  %773 = vmatpush.msra.mxu1 %v772_v12  ;;  %v4000_v12 = vand.u32 4294901760, %v687_v44  ;;  %v4086_v23 = vsub.f32 %v684_v7, %v4048_v61  ;;  %vm1544_vm2 = vcmask 539648   ;;  %vm1621_vm3 = vcmask 130048  }
  0x29   : > { %862 = vmatpush.msra.mxu2 %v3894_v52  ;;  %908 = vmatpush.msra.mxu3 %v3868_v41  ;;  %v1088_v14 = vsub.f32 %v4014_v38, %v5178_v36  ;;  %vm1623_vm4 = vcmask 654336   ;;  %vm1723_vm7 = vcmask 523264  }
  0x2a   : > { %714 = vmatpush.msra.mxu0 %v3890_v50  ;;  %779 = vmatpush.msra.mxu1 %v778_v34  ;;  %v807_v34 = vsub.f32 %v3947_v26, %v5164_v48  ;;  %v813_v48 = vsub.f32 %v3964_v39, %v5168_v62  ;;  %v4036_v58 = vsub.f32 %v687_v44, %v4000_v12 }
  0x2b   : > { %865 = vmatpush.msra.mxu2 %v3899_v53  ;;  %910 = vmatpush.msra.mxu3 %v3890_v50  ;;  %v819_v62 = vsub.f32 %v3980_v49, %v5174_v37  ;;  %v4080_v37 = vsub.f32 %v685_v13, %v4038_v51 }
  0x2c   : > { %716 = vmatpush.msra.mxu0 %v3908_v57  ;;  %785 = vmatpush.msra.mxu1 %v784_v47  ;;  %v5177_v47 = vand.u32 4294901760, %v3987_v55  ;;  %v808_v44 = vand.u32 4294901760, %v807_v34  ;;  %v814_v59 = vand.u32 4294901760, %v813_v48  ;;  %v681_v48 = vld [vmem:[%s5155_s16 + $0xb0] sm:$0xff] }
  0x2d   : > { %868 = vmatpush.msra.mxu2 %v3927_v1  ;;  %912 = vmatpush.msra.mxu3 %v3908_v57 }
  0x2e   : > { %718 = vmatpush.msra.mxu0 %v3923_v63  ;;  %791 = vmatpush.msra.mxu1 %v790_v60  ;;  %v1076_v60 = vsub.f32 %v3972_v43, %v5171_v6  ;;  %v1082_v6 = vsub.f32 %v3990_v56, %v5173_v0  ;;  %v825_v34 = vsub.f32 %v3987_v55, %v5177_v47  ;;  %v5179_v0 = vand.u32 4294901760, %v4036_v58 }
  0x2f   : > { %871 = vmatpush.msra.mxu2 %v3947_v26  ;;  %914 = vmatpush.msra.mxu3 %v3923_v63  ;;  %v4102_v47 = vsub.f32 %v683_v45, %v4063_v27  ;;  %v5196_v45 = vand.u32 4294901760, %v3807_v16 }
  0x30   : > { %720 = vmatpush.msra.mxu0 %v3944_v18  ;;  %797 = vmatpush.msra.mxu1 %v796_v2  ;;  %v682_v2 = vld [vmem:[%s5155_s16 + $0xb8] sm:$0xff]  ;;  %v1077_v24 = vand.u32 4294901760, %v1076_v60  ;;  %v5195_v60 = vand.u32 4294901760, %v3803_v15  ;;  %v1083_v7 = vand.u32 4294901760, %v1082_v6  ;;  %v1094_v15 = vsub.f32 %v4036_v58, %v5179_v0 }
  0x31   : > { %874 = vmatpush.msra.mxu2 %v3964_v39  ;;  %916 = vmatpush.msra.mxu3 %v3944_v18  ;;  %v4096_v13 = vand.u32 4294901760, %v682_v2  ;;  %v4113_v6 = vand.u32 4294901760, %v681_v48 }
  0x32   : > { %722 = vmatpush.msra.mxu0 %v3951_v30  ;;  %803 = vmatpush.msra.mxu1 %v802_v32  ;;  %v820_v32 = vand.u32 4294901760, %v819_v62  ;;  %v680_v62 = vld [vmem:[%s5155_s16 + $0xa8] sm:$0xff] }
  0x33   : > { %877 = vmatpush.msra.mxu2 %v3980_v49  ;;  %918 = vmatpush.msra.mxu3 %v3951_v30  ;;  %v4128_v16 = vand.u32 4294901760, %v680_v62  ;;  %v4148_v36 = vsub.f32 %v681_v48, %v4113_v6 }
  0x34   : > { %929 = vmatpush.msrb.mxu0 %v734_v22  ;;  %809 = vmatpush.msra.mxu1 %v808_v44  ;;  %v5180_v22 = vand.u32 4294901760, %v4056_v33  ;;  %v826_v44 = vand.u32 4294901760, %v825_v34  ;;  %v1089_v34 = vand.u32 4294901760, %v1088_v14  ;;  %v1095_v14 = vand.u32 4294901760, %v1094_v15 }
  0x35   : > { %880 = vmatpush.msra.mxu2 %v3987_v55  ;;  %1078 = vmatpush.msrb.mxu3 %v1077_v24  ;;  %v5198_v24 = vand.u32 4294901760, %v3815_v19  ;;  %v4162_v48 = vsub.f32 %v680_v62, %v4128_v16 }
  0x36   : > { %933 = vmatpush.msrb.mxu0 %v5195_v60  ;;  %815 = vmatpush.msra.mxu1 %v814_v59  ;;  %v679_v59 = vld [vmem:[%s5155_s16 + $0xa0] sm:$0xff]  ;;  %v1100_v0 = vsub.f32 %v4056_v33, %v5180_v22  ;;  %v4126_v60 = vsub.f32 %v682_v2, %v4096_v13  ;;  %v678_v2 = vld [vmem:[%s5155_s16 + $0x98] sm:$0xff] }
  0x37   : > { %1033 = vmatpush.msrb.mxu2 %v3938_v8  ;;  %1084 = vmatpush.msrb.mxu3 %v1083_v7  ;;  %v4150_v19 = vand.u32 4294901760, %v679_v59  ;;  %v5200_v7 = vand.u32 4294901760, %v3818_v20  ;;  %v5202_v20 = vand.u32 4294901760, %v3821_v21 }
  0x38   : > { %937 = vmatpush.msrb.mxu0 %v5196_v45  ;;  %821 = vmatpush.msra.mxu1 %v820_v32  ;;  %v5199_v45 = vand.u32 4294901760, %v4080_v37  ;;  %v657_v32 = vld [vmem:[%s4135_s22] sm:$0xff]  ;;  %v1101_v15 = vand.u32 4294901760, %v1100_v0  ;;  %v677_v0 = vld [vmem:[%s5155_s16 + $0x90] sm:$0xff] }
  0x39   : > { %1035 = vmatpush.msrb.mxu2 %v3953_v31  ;;  %1090 = vmatpush.msrb.mxu3 %v1089_v34  ;;  %v5184_v34 = vand.u32 4294901760, %v4148_v36  ;;  %v4180_v21 = vand.u32 4294901760, %v657_v32 }
  0x3a   : > { %941 = vmatpush.msrb.mxu0 %v5198_v24  ;;  %827 = vmatpush.msra.mxu1 %v826_v44  ;;  %v1106_v22 = vsub.f32 %v4080_v37, %v5199_v45  ;;  %v5201_v24 = vand.u32 4294901760, %v4086_v23  ;;  %v5183_v45 = vand.u32 4294901760, %v4126_v60 }
  0x3b   : > { %1037 = vmatpush.msrb.mxu2 %v3982_v54  ;;  %v4164_v54 = vand.u32 4294901760, %v678_v2  ;;  %1096 = vmatpush.msrb.mxu3 %v1095_v14  ;;  %v4193_v14 = vand.u32 4294901760, %v677_v0 }
  0x3c   : > { %945 = vmatpush.msrb.mxu0 %v5200_v7  ;;  %996 = vmatpush.msrb.mxu1 %v3771_v3  ;;  %v1112_v44 = vsub.f32 %v4086_v23, %v5201_v24  ;;  %v5203_v3 = vand.u32 4294901760, %v4102_v47  ;;  %v1107_v62 = vand.u32 4294901760, %v1106_v22  ;;  %v4178_v24 = vsub.f32 %v679_v59, %v4150_v19 }
  0x3d   : > { %1039 = vmatpush.msrb.mxu2 %v4000_v12  ;;  %1102 = vmatpush.msrb.mxu3 %v1101_v15  ;;  %v1124_v22 = vsub.f32 %v4126_v60, %v5183_v45  ;;  %v1135_v59 = vand.u32 4294901760, %v4162_v48  ;;  %v1130_v15 = vsub.f32 %v4148_v36, %v5184_v34  ;;  %v4207_v45 = vsub.f32 %v657_v32, %v4180_v21 }
  0x3e   : > { %949 = vmatpush.msrb.mxu0 %v5202_v20  ;;  %998 = vmatpush.msrb.mxu1 %v3773_v4  ;;  %v1118_v7 = vsub.f32 %v4102_v47, %v5203_v3  ;;  %v5204_v4 = vand.u32 4294901760, %v3838_v29  ;;  %v1113_v20 = vand.u32 4294901760, %v1112_v44  ;;  %v676_v3 = vld [vmem:[%s5155_s16 + $0x88] sm:$0xff]  ;;  %v4196_v29 = vsub.f32 %v678_v2, %v4164_v54 }
  0x3f   : > { %1041 = vmatpush.msrb.mxu2 %v4016_v42  ;;  %1108 = vmatpush.msrb.mxu3 %v1107_v62  ;;  %v4209_v2 = vand.u32 4294901760, %v676_v3  ;;  %v1136_v32 = vsub.f32 %v4162_v48, %v1135_v59  ;;  %v5207_v34 = vand.u32 4294901760, %v3894_v52  ;;  %v5208_v52 = vand.u32 4294901760, %v3899_v53 }
  0x40   : > { %953 = vmatpush.msrb.mxu0 %v5204_v4  ;;  %1000 = vmatpush.msrb.mxu1 %v3775_v5  ;;  %v5205_v5 = vand.u32 4294901760, %v3865_v40  ;;  %v1119_v44 = vand.u32 4294901760, %v1118_v7  ;;  %v1141_v4 = vand.u32 4294901760, %v4178_v24  ;;  %v675_v40 = vld [vmem:[%s5155_s16 + $0x80] sm:$0xff]  ;;  %v1125_v7 = vand.u32 4294901760, %v1124_v22 }
  0x41   : > { %1043 = vmatpush.msrb.mxu2 %v4038_v51  ;;  %1114 = vmatpush.msrb.mxu3 %v1113_v20  ;;  %v1147_v62 = vand.u32 4294901760, %v4196_v29  ;;  %v4235_v22 = vand.u32 4294901760, %v4207_v45 }
  0x42   : > { %957 = vmatpush.msrb.mxu0 %v5205_v5  ;;  %1002 = vmatpush.msrb.mxu1 %v3786_v9  ;;  %v5206_v9 = vand.u32 4294901760, %v3879_v46  ;;  %v4223_v5 = vsub.f32 %v677_v0, %v4193_v14  ;;  %v1131_v46 = vand.u32 4294901760, %v1130_v15  ;;  %v1142_v20 = vsub.f32 %v4178_v24, %v1141_v4 }
  0x43   : > { %1045 = vmatpush.msrb.mxu2 %v4048_v61  ;;  %1120 = vmatpush.msrb.mxu3 %v1119_v44  ;;  %v4238_v0 = vsub.f32 %v676_v3, %v4209_v2  ;;  %v1148_v44 = vsub.f32 %v4196_v29, %v1147_v62  ;;  %v5209_v3 = vand.u32 4294901760, %v3927_v1  ;;  %v5210_v1 = vand.u32 4294901760, %v3947_v26 }
  0x44   : > { %961 = vmatpush.msrb.mxu0 %v5206_v9  ;;  %1004 = vmatpush.msrb.mxu1 %v3788_v10  ;;  %v4228_v10 = vand.u32 4294901760, %v675_v40  ;;  %v1153_v15 = vand.u32 4294901760, %v4223_v5  ;;  %v726_v9 = vsub.f32 %v4207_v45, %v4235_v22 }
  0x45   : > { %1047 = vmatpush.msrb.mxu2 %v4063_v27  ;;  %1126 = vmatpush.msrb.mxu3 %v1125_v7  ;;  %v1159_v7 = vand.u32 4294901760, %v4238_v0 }
  0x46   : > { %965 = vmatpush.msrb.mxu0 %v5207_v34  ;;  %1006 = vmatpush.msrb.mxu1 %v3790_v11  ;;  %v4244_v11 = vld [vmem:[%s4135_s22 + $0x8] sm:$0xff]  ;;  %v1137_v34 = vand.u32 4294901760, %v1136_v32  ;;  %v4255_v53 = vsub.f32 %v675_v40, %v4228_v10  ;;  %v1154_v40 = vsub.f32 %v4223_v5, %v1153_v15  ;;  %v4276_v26 = vand.u32 4294901760, %v726_v9 }
  0x47   : > { %1049 = vmatpush.msrb.mxu2 %v4096_v13  ;;  %1132 = vmatpush.msrb.mxu3 %v1131_v46  ;;  %v4262_v32 = vand.u32 4294901760, %v4244_v11  ;;  %v5211_v46 = vand.u32 4294901760, %v3964_v39  ;;  %v5212_v39 = vand.u32 4294901760, %v3980_v49 }
  0x48   : > { %969 = vmatpush.msrb.mxu0 %v5208_v52  ;;  %1008 = vmatpush.msrb.mxu1 %v3809_v17  ;;  %v1143_v17 = vand.u32 4294901760, %v1142_v20  ;;  %v1165_v20 = vand.u32 4294901760, %v4255_v53 }
  0x49   : > { %1051 = vmatpush.msrb.mxu2 %v4113_v6  ;;  %1138 = vmatpush.msrb.mxu3 %v1137_v34  ;;  %v4283_v52 = vsub.f32 %v4244_v11, %v4262_v32  ;;  %v5213_v34 = vand.u32 4294901760, %v3987_v55 }
  0x4a   : > { %973 = vmatpush.msrb.mxu0 %v5209_v3  ;;  %1010 = vmatpush.msrb.mxu1 %v3828_v25  ;;  %v1149_v25 = vand.u32 4294901760, %v1148_v44  ;;  %v1166_v44 = vsub.f32 %v4255_v53, %v1165_v20 }
  0x4b   : > { %1053 = vmatpush.msrb.mxu2 %v4128_v16  ;;  %1144 = vmatpush.msrb.mxu3 %v1143_v17 }
  0x4c   : > { %977 = vmatpush.msrb.mxu0 %v5210_v1  ;;  %1012 = vmatpush.msrb.mxu1 %v3835_v28  ;;  %v1160_v28 = vsub.f32 %v4238_v0, %v1159_v7  ;;  %v1530_v1 = vld [vmem:[%s5146_s7] sm:$0xff] }
  0x4d   : > { %1055 = vmatpush.msrb.mxu2 %v4150_v19  ;;  %1150 = vmatpush.msrb.mxu3 %v1149_v25 }
  0x4e   : > { %981 = vmatpush.msrb.mxu0 %v5211_v46  ;;  %1014 = vmatpush.msrb.mxu1 %v3856_v35  ;;  %v1155_v35 = vand.u32 4294901760, %v1154_v40  ;;  %v1161_v49 = vand.u32 4294901760, %v1160_v28 }
  0x4f   : > { %1057 = vmatpush.msrb.mxu2 %v4164_v54  ;;  %728 = vmatmul.f32.vlgmr.msra.gmra.mxu0 %v4276_v26 }
  0x50   : > { %985 = vmatpush.msrb.mxu0 %v5212_v39  ;;  %1016 = vmatpush.msrb.mxu1 %v3868_v41  ;;  %v4298_v41 = vand.u32 4294901760, %v4283_v52 }
  0x51   : > { %1059 = vmatpush.msrb.mxu2 %v4193_v14  ;;  %1156 = vmatpush.msrb.mxu3 %v1155_v35 }
  0x52   : > { %989 = vmatpush.msrb.mxu0 %v5213_v34  ;;  %1018 = vmatpush.msrb.mxu1 %v3890_v50  ;;  %v1167_v50 = vand.u32 4294901760, %v1166_v44  ;;  %v1067_v55 = vsub.f32 %v4283_v52, %v4298_v41  ;;  %v3619_v44 = vmov 2  }
  0x53   : > { %1061 = vmatpush.msrb.mxu2 %v4209_v2  ;;  %1162 = vmatpush.msrb.mxu3 %v1161_v49 }
  0x54   : > { %1176 = vmatpush.msra.mxu0 %v3972_v43  ;;  %1020 = vmatpush.msrb.mxu1 %v3908_v57  ;;  %v5214_v57 = vand.u32 4294901760, %v3972_v43  ;;  %v4317_v3 = vand.u32 4294901760, %v1067_v55  ;;  %v5217_v43 = vand.u32 4294901760, %v4036_v58  ;;  %v3621_v55 = vmov 1  }
  0x55   : > { %883 = vmatmul.f32.vlgmr.msra.gmra.mxu2 %v4207_v45  ;;  %922 = vmatmul.f32.vlgmr.msra.gmra.mxu3 %v4235_v22 }
  0x56   : > { %1179 = vmatpush.msra.mxu0 %v3990_v56  ;;  %1022 = vmatpush.msrb.mxu1 %v3923_v63  ;;  %v5215_v63 = vand.u32 4294901760, %v3990_v56  ;;  %v5218_v56 = vld [vmem:[#allocation2_spill] sm:$0xff] }
  0x57   : > { %1063 = vmatpush.msrb.mxu2 %v4228_v10  ;;  %1168 = vmatpush.msrb.mxu3 %v1167_v50 }
  0x58   : > { %1182 = vmatpush.msra.mxu0 %v4014_v38  ;;  %1024 = vmatpush.msrb.mxu1 %v3944_v18  ;;  %v5216_v18 = vand.u32 4294901760, %v4014_v38 }
  0x59   : > { %1270 = vmatpush.msra.mxu2 %v5214_v57  ;;  %829 = vmatmul.f32.vlgmr.msra.gmra.mxu1 %v4180_v21  ;;  %v3622_v57 = vmov 4  }
  0x5a   : > { %1185 = vmatpush.msra.mxu0 %v4036_v58  ;;  %1337 = vmatpush.msra.mxu3 %v3938_v8  ;;  %v5220_v58 = vand.u32 4294901760, %v4080_v37 }
  0x5b   : > { %1274 = vmatpush.msra.mxu2 %v5215_v63  ;;  %1026 = vmatpush.msrb.mxu1 %v3951_v30  ;;  %v5222_v30 = vand.u32 4294901760, %v4102_v47 }
  0x5c   : > { %1188 = vmatpush.msra.mxu0 %v4056_v33  ;;  %1339 = vmatpush.msra.mxu3 %v3953_v31 }
  0x5d   : > { %1229 = vmatpush.msra.mxu1 %v3938_v8  ;;  %1278 = vmatpush.msra.mxu2 %v5216_v18  ;;  %v5219_v8 = vand.u32 4294901760, %v4056_v33  ;;  %v5221_v33 = vand.u32 4294901760, %v4086_v23 }
  0x5e   : > { %1069 = vmatmul.f32.vlgmr.msrb.gmra.mxu2 %v4317_v3  ;;  %1191 = vmatpush.msra.mxu0 %v4080_v37 }
  0x5f   : > { %1231 = vmatpush.msra.mxu1 %v3953_v31  ;;  %1282 = vmatpush.msra.mxu2 %v5217_v43  ;;  %v5223_v31 = vand.u32 4294901760, %v4126_v60 }
  0x60   : > { %1341 = vmatpush.msra.mxu3 %v5218_v56  ;;  %991 = vmatmul.f32.vlgmr.msrb.gmra.mxu0 %v4180_v21 }
  0x61   : > { %1170 = vmatmul.f32.vlgmr.msrb.gmra.mxu3 %v4262_v32  ;;  %1194 = vmatpush.msra.mxu0 %v4086_v23  ;;  %v5224_v23 = vand.u32 4294901760, %v4148_v36 }
  0x62   : > { %1233 = vmatpush.msra.mxu1 %v5218_v56  ;;  %1286 = vmatpush.msra.mxu2 %v5219_v8 }
  0x63   : > { %1343 = vmatpush.msra.mxu3 %v4000_v12  ;;  %1028 = vmatmul.f32.vlgmr.msrb.gmra.mxu1 %v4180_v21 }
  0x64   : > { %1197 = vmatpush.msra.mxu0 %v4102_v47  ;;  %1235 = vmatpush.msra.mxu1 %v4000_v12 }
  0x65   : > { %1290 = vmatpush.msra.mxu2 %v5220_v58  ;;  %1345 = vmatpush.msra.mxu3 %v4016_v42 }
  0x66   : > { %1200 = vmatpush.msra.mxu0 %v4126_v60  ;;  %1237 = vmatpush.msra.mxu1 %v4016_v42 }
  0x67   : > { %1294 = vmatpush.msra.mxu2 %v5221_v33  ;;  %1347 = vmatpush.msra.mxu3 %v4038_v51 }
  0x68   : > { %1203 = vmatpush.msra.mxu0 %v4148_v36  ;;  %1239 = vmatpush.msra.mxu1 %v4038_v51 }
  0x69   : > { %1298 = vmatpush.msra.mxu2 %v5222_v30  ;;  %1349 = vmatpush.msra.mxu3 %v4048_v61 }
  0x6a   : > { %1206 = vmatpush.msra.mxu0 %v4162_v48  ;;  %1241 = vmatpush.msra.mxu1 %v4048_v61  ;;  %v1373_v61 = vld [vmem:[%s5225_s5] sm:$0xff]  ;;  %s3625_s5 = smov 125  }
  0x6b   : > { %1302 = vmatpush.msra.mxu2 %v5223_v31  ;;  %1351 = vmatpush.msra.mxu3 %v4063_v27  ;;  %v1382_v60 = vsel %vm1380_vm0, %v1373_v61, 0 }
  0x6c   : > { %1209 = vmatpush.msra.mxu0 %v4178_v24  ;;  %1243 = vmatpush.msra.mxu1 %v4063_v27  ;;  %v1401_v48 = vand.u32 4294901760, %v1382_v60 }
  0x6d   : > { %1306 = vmatpush.msra.mxu2 %v5224_v23  ;;  %1353 = vmatpush.msra.mxu3 %v4096_v13 }
  0x6e   : > { %1212 = vmatpush.msra.mxu0 %v4196_v29  ;;  %1245 = vmatpush.msra.mxu1 %v4096_v13  ;;  %v1374_v29 = vld [vmem:[%s5145_s6] sm:$0xff] }
  0x6f   : > { %1310 = vmatpush.msra.mxu2 %v1135_v59  ;;  %1355 = vmatpush.msra.mxu3 %v4113_v6 }
  0x70   : > { %1215 = vmatpush.msra.mxu0 %v4223_v5  ;;  %1247 = vmatpush.msra.mxu1 %v4113_v6  ;;  %v3617_v5 = vmov 3  }
  0x71   : > { %1314 = vmatpush.msra.mxu2 %v1141_v4  ;;  %1357 = vmatpush.msra.mxu3 %v4128_v16  ;;  %v4411_v4 = vld [vmem:[%s5158_s19] sm:$0x1f] }
  0x72   : > { %1218 = vmatpush.msra.mxu0 %v4238_v0  ;;  %1249 = vmatpush.msra.mxu1 %v4128_v16  ;;  %v3616_v16 = vmov 0   ;;  %v1554_v50 = vperm.slane %v4411_v4, 1 }
  0x73   : > { %1318 = vmatpush.msra.mxu2 %v1147_v62  ;;  %1359 = vmatpush.msra.mxu3 %v4150_v19  ;;  %v1570_v62 = vperm.slane %v4411_v4, 3 }
  0x74   : > { %1221 = vmatpush.msra.mxu0 %v4255_v53  ;;  %1251 = vmatpush.msra.mxu1 %v4150_v19 }
  0x75   : > { %1322 = vmatpush.msra.mxu2 %v1153_v15  ;;  %1361 = vmatpush.msra.mxu3 %v4164_v54 }
  0x76   : > { %1224 = vmatmul.f32.vlgmr.msra.gmra.mxu0 %v4283_v52  ;;  %1253 = vmatpush.msra.mxu1 %v4164_v54 }
  0x77   : > { %1326 = vmatpush.msra.mxu2 %v1159_v7  ;;  %1363 = vmatpush.msra.mxu3 %v4193_v14 }
  0x78   : > { %1255 = vmatpush.msra.mxu1 %v4193_v14  ;;  %3568 = vset.pattern.permute.xlu0 %v3616_v16  ;;  %v1402_v14 = vsub.f32 %v1382_v60, %v1401_v48 }
  0x79   : > { %1330 = vmatpush.msra.mxu2 %v1165_v20  ;;  %1365 = vmatpush.msra.mxu3 %v4209_v2 }
  0x7a   : > { %1332 = vmatmul.f32.vlgmr.msra.gmra.mxu2 %v4262_v32  ;;  %1257 = vmatpush.msra.mxu1 %v4209_v2  ;;  %v1403_v15 = vand.u32 4294901760, %v1402_v14 }
  0x7b   : > { %1367 = vmatpush.msra.mxu3 %v4228_v10  ;;  %1377 = vperm.xlu0 %3568, %v1374_v29  }
  0x7c   : > { %1369 = vmatmul.f32.vlgmr.msra.gmra.mxu3 %v4262_v32  ;;  %1259 = vmatpush.msra.mxu1 %v4228_v10  ;;  %v1404_v7 = vsub.f32 %v1402_v14, %v1403_v15 }
  0x7d   : > { %1263 = vmatmul.f32.vlgmr.msra.gmra.mxu1 %v4298_v41  ;;  %3570 = vset.pattern.permute.xlu2 %v3617_v5 }
  0x7e   : > { %1572 = vrot.lane.b32.xlu2 %v1570_v62, %s3618_s27  ;;  %v1405_v20 = vand.u32 4294901760, %v1404_v7  ;;  %1556 = vrot.lane.b32.xlu1 %v1554_v50, %s3620_s0  ;;  %v1602_v62 = vld [vmem:[%s5147_s8] sm:$0xff]  ;;  %s3633_s27 = smov 120  }
  0x7f   : > { %3569 = vset.pattern.permute.xlu1 %v3621_v55  ;;  %v1609_v7 = vld [vmem:[%s5148_s9] sm:$0xff] }
  0x86   : > { %1577 = vperm.xlu2 %3570, %v1530_v1   ;;  %1561 = vperm.xlu1 %3569, %v1530_v1  }
  0x8e   : > { %3572 = vset.pattern.permute.xlu2 %v3619_v44  ;;  %3571 = vset.pattern.permute.xlu1 %v3622_v57 }
  0x8f   : > { %1534 = vperm.xlu2 %3572, %v1530_v1   ;;  %1593 = vperm.xlu1 %3571, %v1530_v1  }
  0x97   : > { %3576 = vset.pattern.permute.xlu2 %v3622_v57  ;;  %3573 = vset.pattern.permute.xlu1 %v3616_v16 }
  0xcc   : > { %v729_v36 = vpop.f32.mrf.mxu0 }
  0xd6   : > { %v830_v27 = vpop.f32.mrf.mxu1 }
  0xd7   : > { %v831_v51 = vadd.f32 %v830_v27, %v729_v36 }
  0xd8   : > { %v884_v38 = vpop.f32.mrf.mxu2  ;;  %v923_v12 = vpop.f32.mrf.mxu3 }
  0xd9   : > { %v885_v54 = vadd.f32 %v884_v38, %v831_v51  ;;  %v1586_v38 = vperm.slane %v4411_v4, 4 }
  0xdb   : > { %v924_v37 = vadd.f32 %v923_v12, %v885_v54  ;;  %v1573_v12 = vpop.permute.xlu2 %1572 }
  0xdd   : > { %v992_v42 = vpop.f32.mrf.mxu0 }
  0xde   : > { %v993_v47 = vadd.f32 %v992_v42, %v924_v37 }
  0xe0   : > { %v1029_v13 = vpop.f32.mrf.mxu1 }
  0xe1   : > { %v1030_v6 = vadd.f32 %v1029_v13, %v993_v47  ;;  %v1070_v19 = vpop.f32.mrf.mxu2 }
  0xe3   : > { %v1071_v24 = vadd.f32 %v1070_v19, %v1030_v6  ;;  %v1578_v6 = vpop.permute.xlu2 %1577 }
  0xe4   : > { %v1171_v59 = vpop.f32.mrf.mxu3 }
  0xe5   : > { %v1172_v10 = vadd.f32 %v1171_v59, %v1071_v24 }
  0xed   : > { %v1378_v63 = vpop.permute.xlu0 %1377 }
  0xf0   : > { %v1557_v54 = vpop.permute.xlu1 %1556 }
  0xf3   : > { %v1225_v2 = vpop.f32.mrf.mxu0 }
  0xf4   : > { %v1226_v0 = vadd.f32 %v1225_v2, %v1172_v10  ;;  %v1546_v2 = vperm.slane %v4411_v4, 0  ;;  %v1535_v10 = vpop.permute.xlu2 %1534  ;;  %v1610_v4 = vld [vmem:[%s5159_s20] sm:$0x1f] }
  0xf8   : > { %v1562_v37 = vpop.permute.xlu1 %1561 }
  0xfa   : > { %v1264_v53 = vpop.f32.mrf.mxu1 }
  0xfb   : > { %v1265_v17 = vadd.f32 %v1264_v53, %v1226_v0 }
  0xfd   : > { %v1333_v9 = vpop.f32.mrf.mxu2 }
  0xfe   : > { %v1334_v25 = vadd.f32 %v1333_v9, %v1265_v17 }
  0xff   : > { %v1370_v40 = vpop.f32.mrf.mxu3 }
 0x100   : > { %v1371_v46 = vadd.f32 %v1370_v40, %v1334_v25  ;;  %v1633_v25 = vperm.slane %v1610_v4, 1  ;;  %v1649_v40 = vperm.slane %v1610_v4, 3 }
 0x101   : > { %v1594_v59 = vpop.permute.xlu1 %1593 }
 0x102   : > { %v1399_v28 = vand.u32 4294901760, %v1371_v46 }
 0x104   : > { %v1426_v39 = vsub.f32 %v1371_v46, %v1399_v28  ;;  %1400 = vmatpush.msrb.mxu0 %v1399_v28  ;;  %1476 = vmatpush.msrb.mxu3 %v1399_v28 }
 0x105   : > { %1406 = vmatmul.f32.vlgmr.msrb.gmra.mxu0 %v1405_v20  ;;  %1480 = vmatmul.f32.vlgmr.msrb.gmra.mxu3 %v1403_v15 }
 0x106   : > { %v1427_v35 = vand.u32 4294901760, %v1426_v39  ;;  %1453 = vmatpush.msrb.mxu2 %v1426_v39 }
 0x107   : > { %1456 = vmatmul.f32.vlgmr.msrb.gmra.mxu2 %v1402_v14 }
 0x108   : > { %v1428_v34 = vsub.f32 %v1426_v39, %v1427_v35  ;;  %1502 = vmatpush.msra.mxu0 %v1427_v35 }
 0x10a   : > { %v1429_v49 = vand.u32 4294901760, %v1428_v34 }
 0x10c   : > { %1430 = vmatpush.msrb.mxu1 %v1429_v49 }
 0x10d   : > { %1432 = vmatmul.f32.vlgmr.msrb.gmra.mxu1 %v1401_v48  ;;  %1504 = vmatmul.f32.vlgmr.msra.gmra.mxu0 %v1401_v48 }
 0x10e   : > { %1524 = vmatpush.msra.mxu1 %v1399_v28 }
 0x115   : > { %1526 = vmatmul.f32.vlgmr.msra.gmra.mxu1 %v1401_v48 }
 0x182   : > { %v1407_v18 = vpop.f32.mrf.mxu0 }
 0x183   : > { %v1408_v43 = vadd.f32 %v1407_v18, %v1378_v63 }
 0x188   : > { %v1481_v33 = vpop.f32.mrf.mxu3 }
 0x18a   : > { %v1433_v56 = vpop.f32.mrf.mxu1  ;;  %v1457_v8 = vpop.f32.mrf.mxu2 }
 0x18b   : > { %v1434_v58 = vadd.f32 %v1433_v56, %v1408_v43  ;;  %v1505_v31 = vpop.f32.mrf.mxu0 }
 0x18d   : > { %v1458_v30 = vadd.f32 %v1457_v8, %v1434_v58 }
 0x18f   : > { %v1482_v23 = vadd.f32 %v1481_v33, %v1458_v30 }
 0x191   : > { %v1506_v27 = vadd.f32 %v1505_v31, %v1482_v23 }
 0x192   : > { %v1527_v36 = vpop.f32.mrf.mxu1 }
 0x193   : > { %v1528_v51 = vadd.f32 %v1527_v36, %v1506_v27 }
 0x195   : > { %1539 = vrot.lane.b32.xlu0 %v1528_v51, %s3623_s4  ;;  %v1537_v53 = vmul.f32 %v1535_v10, %v1528_v51  ;;  %s5026_s4 = scalar_lea.vmem %s5160_s21, %s3530_s28 }
 0x19d   : > { %1588 = vrot.lane.b32.xlu0 %v1586_v38, %s3624_s30  ;;  %s3628_s30 = smov 32  }
 0x1a5   : > { %1549 = vperm.xlu0 %3568, %v1530_v1   ;;  %v1665_v1 = vperm.slane %v1610_v4, 4 }
 0x1ad   : > { %3575 = vset.pattern.permute.xlu0 %v3617_v5 }
 0x207   : > { %v1540_v42 = vpop.permute.xlu0 %1539 }
 0x208   : > { %v1543_v47 = vsel %vm1542_vm1, 0.0, %v1540_v42  ;;  %vm2693_vm1 = vcmask 31744  }
 0x209   : > { %v1545_v61 = vsel %vm1544_vm2, %v1543_v47, 0.0 }
 0x20a   : > { %v1575_v13 = vmul.f32 %v1573_v12, %v1545_v61  ;;  %v1559_v60 = vmul.f32 %v1557_v54, %v1545_v61  ;;  %v1547_v0 = vmul.f32 %v1546_v2, %v1545_v61  ;;  %v1681_v12 = vld [vmem:[%s5149_s10] sm:$0xff]  ;;  %v1717_v2 = vld [vmem:[%s5156_s17 + $0x50] sm:$0xff] }
 0x20c   : > { %v1564_v19 = vmul.f32 %v1562_v37, %v1559_v60  ;;  %v1580_v48 = vmul.f32 %v1578_v6, %v1575_v13  ;;  %v1625_v37 = vperm.slane %v1610_v4, 0  ;;  %v1713_v4 = vld [vmem:[%s5156_s17 + $0x30] sm:$0xff] }
 0x20e   : > { %1582 = vrot.lane.b32.xlu2 %v1580_v48, %s3625_s5  ;;  %1566 = vrot.lane.b32.xlu1 %v1564_v19, %s3626_s23  ;;  %s3629_s5 = smov 8   ;;  %v1721_v48 = vld [vmem:[%s5156_s17 + $0x70] sm:$0xff] }
 0x20f   : > { %v1589_v24 = vpop.permute.xlu0 %1588 }
 0x210   : > { %v1591_v14 = vmul.f32 %v1589_v24, %v1545_v61  ;;  %v4464_v24 = vand.u32 4294901760, %v1721_v48 }
 0x212   : > { %v1596_v29 = vmul.f32 %v1594_v59, %v1591_v14  ;;  %v1719_v59 = vld [vmem:[%s5156_s17 + $0x60] sm:$0xff]  ;;  %v4470_v14 = vsub.f32 %v1721_v48, %v4464_v24  ;;  %1868 = vmatpush.msrb.mxu1 %v4464_v24  ;;  %1736 = vmatpush.msra.mxu2 %v4464_v24 }
 0x214   : > { %1598 = vrot.lane.b32.xlu0 %v1596_v29, %s3627_s26  ;;  %s3632_s26 = smov 104   ;;  %v4472_v29 = vand.u32 4294901760, %v1719_v59  ;;  %1831 = vmatpush.msrb.mxu0 %v4470_v14 }
 0x216   : > { %1605 = vperm.xlu1 %3573, %v1602_v62   ;;  %1651 = vrot.lane.b32.xlu2 %v1649_v40, %s3630_s1  ;;  %s5226_s1 = sld [smem:[#allocation6_spill]]  ;;  %v1770_v62 = vand.u32 4294901760, %v4470_v14  ;;  %v4481_v10 = vsub.f32 %v1719_v59, %v4472_v29  ;;  %v1720_v59 = vld [vmem:[%s5156_s17 + $0x68] sm:$0xff] }
 0x217   : > { %v1550_v15 = vpop.permute.xlu0 %1549  ;;  %1870 = vmatpush.msrb.mxu1 %v4472_v29  ;;  %1738 = vmatpush.msra.mxu2 %v4472_v29 }
 0x218   : > { %v1552_v17 = vmul.f32 %v1550_v15, %v1547_v0  ;;  %v4484_v0 = vand.u32 4294901760, %v1717_v2  ;;  %v1715_v15 = vld [vmem:[%s5156_s17 + $0x40] sm:$0xff]  ;;  %1834 = vmatpush.msrb.mxu0 %v4481_v10 }
 0x21a   : > { %v1553_v9 = vadd.f32 %v1552_v17, %v1537_v53  ;;  %v1771_v53 = vsub.f32 %v4470_v14, %v1770_v62  ;;  %v1776_v17 = vand.u32 4294901760, %v4481_v10  ;;  %1872 = vmatpush.msrb.mxu1 %v4484_v0  ;;  %1740 = vmatpush.msra.mxu2 %v4484_v0 }
 0x21c   : > { %1635 = vrot.lane.b32.xlu0 %v1633_v25, %s3629_s5  ;;  %v4450_v61 = vld [vmem:[%s5226_s1] sm:$0xf]  ;;  %v1777_v25 = vsub.f32 %v4481_v10, %v1776_v17  ;;  %s3636_s5 = smov 15   ;;  %s3637_s1 = smov 17  }
 0x21e   : > { %3574 = vset.pattern.permute.xlu1 %v3621_v55 }
 0x21f   : > { %1640 = vperm.xlu1 %3574, %v1609_v7  }
 0x224   : > { %1656 = vperm.xlu0 %3575, %v1609_v7  }
 0x227   : > { %1667 = vrot.lane.b32.xlu1 %v1665_v1, %s3628_s30  ;;  %v1772_v1 = vand.u32 4294901760, %v1771_v53  ;;  %s5228_s30 = sld [smem:[#allocation5_spill]] }
 0x228   : > { %3577 = vset.pattern.permute.xlu1 %v3619_v44 }
 0x229   : > { %1773 = vmatpush.msra.mxu3 %v1772_v1 }
 0x22c   : > { %3579 = vset.pattern.permute.xlu0 %v3616_v16 }
 0x22f   : > { %1613 = vperm.xlu1 %3577, %v1609_v7  }
 0x237   : > { %3580 = vset.pattern.permute.xlu1 %v3616_v16 }
 0x268   : > { %v1583_v28 = vpop.permute.xlu2 %1582 }
 0x270   : > { %v1652_v63 = vpop.permute.xlu2 %1651 }
 0x280   : > { %v1567_v46 = vpop.permute.xlu1 %1566 }
 0x281   : > { %v1569_v20 = vadd.f32 %v1567_v46, %v1553_v9  ;;  %v4496_v9 = vsub.f32 %v1717_v2, %v4484_v0 }
 0x283   : > { %v1585_v39 = vadd.f32 %v1583_v28, %v1569_v20  ;;  %v1782_v40 = vand.u32 4294901760, %v4496_v9  ;;  %1837 = vmatpush.msrb.mxu0 %v4496_v9  ;;  %v4515_v20 = vand.u32 4294901760, %v1713_v4  ;;  %v1711_v28 = vld [vmem:[%s5156_s17 + $0x20] sm:$0xff] }
 0x286   : > { %v1599_v35 = vpop.permute.xlu0 %1598 }
 0x287   : > { %v1601_v34 = vadd.f32 %v1599_v35, %v1585_v39  ;;  %v1778_v39 = vand.u32 4294901760, %v1777_v25  ;;  %v1783_v35 = vsub.f32 %v4496_v9, %v1782_v40  ;;  %v1716_v25 = vld [vmem:[%s5156_s17 + $0x48] sm:$0xff]  ;;  %v1714_v9 = vld [vmem:[%s5156_s17 + $0x38] sm:$0xff] }
 0x288   : > { %v1606_v49 = vpop.permute.xlu1 %1605 }
 0x289   : > { %v1608_v50 = vadd.f32 %v1606_v49, %v1601_v34  ;;  %v4526_v49 = vand.u32 4294901760, %v1711_v28  ;;  %1779 = vmatpush.msra.mxu3 %v1778_v39 }
 0x28b   : > { %1618 = vrot.lane.b32.xlu2 %v1608_v50, %s3631_s24 }
 0x28e   : > { %v1636_v18 = vpop.permute.xlu0 %1635 }
 0x291   : > { %v1641_v43 = vpop.permute.xlu1 %1640 }
 0x293   : > { %1672 = vperm.xlu2 %3576, %v1609_v7  }
 0x296   : > { %v1657_v33 = vpop.permute.xlu0 %1656 }
 0x299   : > { %v1668_v23 = vpop.permute.xlu1 %1667 }
 0x29b   : > { %3578 = vset.pattern.permute.xlu2 %v3616_v16 }
 0x29c   : > { %1628 = vperm.xlu2 %3578, %v1609_v7   ;;  %v4499_v7 = vand.u32 4294901760, %v1715_v15 }
 0x29e   : > { %v4511_v46 = vsub.f32 %v1715_v15, %v4499_v7  ;;  %1874 = vmatpush.msrb.mxu1 %v4499_v7  ;;  %1742 = vmatpush.msra.mxu2 %v4499_v7  ;;  %v4595_v15 = vand.u32 4294901760, %v1720_v59 }
 0x2a0   : > { %v1788_v34 = vand.u32 4294901760, %v4511_v46  ;;  %1840 = vmatpush.msrb.mxu0 %v4511_v46  ;;  %1876 = vmatpush.msrb.mxu1 %v4515_v20  ;;  %v4607_v1 = vsub.f32 %v1720_v59, %v4595_v15 }
 0x2a1   : > { %v1614_v42 = vpop.permute.xlu1 %1613  ;;  %1744 = vmatpush.msra.mxu2 %v4515_v20 }
 0x2a2   : > { %v1616_v60 = vmul.f32 %v1614_v42, %v1608_v50  ;;  %v4529_v50 = vsub.f32 %v1713_v4, %v4515_v20  ;;  %1878 = vmatpush.msrb.mxu1 %v4526_v49  ;;  %v1718_v4 = vld [vmem:[%s5156_s17 + $0x58] sm:$0xff] }
 0x2a3   : > { %1746 = vmatpush.msra.mxu2 %v4526_v49 }
 0x2a4   : > { %1843 = vmatpush.msrb.mxu0 %v4529_v50 }
 0x2e5   : > { %v1619_v56 = vpop.permute.xlu2 %1618 }
 0x2e6   : > { %v1622_v8 = vsel %vm1621_vm3, 0.0, %v1619_v56  ;;  %v4540_v56 = vsub.f32 %v1711_v28, %v4526_v49  ;;  %v4619_v28 = vand.u32 4294901760, %v1716_v25  ;;  %vm2697_vm3 = vcmask 1043456  }
 0x2e7   : > { %v1624_v58 = vsel %vm1623_vm4, %v1622_v8, 0.0 }
 0x2e8   : > { %v1638_v30 = vmul.f32 %v1636_v18, %v1624_v58  ;;  %v1654_v31 = vmul.f32 %v1652_v63, %v1624_v58  ;;  %v1670_v51 = vmul.f32 %v1668_v23, %v1624_v58  ;;  %v1626_v47 = vmul.f32 %v1625_v37, %v1624_v58  ;;  %v1709_v63 = vld [vmem:[%s5156_s17 + $0x10] sm:$0xff]  ;;  %1846 = vmatpush.msrb.mxu0 %v4540_v56 }
 0x2e9   : > { %v1784_v18 = vand.u32 4294901760, %v1783_v35  ;;  %v4542_v8 = vand.u32 4294901760, %v1709_v63  ;;  %v1794_v58 = vand.u32 4294901760, %v4529_v50 }
 0x2ea   : > { %v1659_v27 = vmul.f32 %v1657_v33, %v1654_v31  ;;  %v1643_v36 = vmul.f32 %v1641_v43, %v1638_v30  ;;  %v1789_v43 = vsub.f32 %v4511_v46, %v1788_v34  ;;  %v1707_v33 = vld [vmem:[%s5156_s17] sm:$0xff]  ;;  %v1800_v31 = vand.u32 4294901760, %v4540_v56  ;;  %v1712_v46 = vld [vmem:[%s5156_s17 + $0x28] sm:$0xff] }
 0x2eb   : > { %1785 = vmatpush.msra.mxu3 %v1784_v18  ;;  %v4552_v23 = vsub.f32 %v1709_v63, %v4542_v8  ;;  %1880 = vmatpush.msrb.mxu1 %v4542_v8  ;;  %v4635_v18 = vand.u32 4294901760, %v1714_v9 }
 0x2ec   : > { %1661 = vrot.lane.b32.xlu1 %v1659_v27, %s3632_s26  ;;  %1645 = vrot.lane.b32.xlu0 %v1643_v36, %s3633_s27  ;;  %v1790_v30 = vand.u32 4294901760, %v1789_v43  ;;  %v4554_v27 = vand.u32 4294901760, %v1707_v33  ;;  %v1795_v36 = vsub.f32 %v4529_v50, %v1794_v58  ;;  %s3638_s26 = smov 113   ;;  %s3640_s27 = smov 112  }
 0x2ed   : > { %v1673_v38 = vpop.permute.xlu2 %1672  ;;  %1748 = vmatpush.msra.mxu2 %v4542_v8  ;;  %1849 = vmatpush.msrb.mxu0 %v4552_v23  ;;  %v4656_v50 = vsub.f32 %v1714_v9, %v4635_v18 }
 0x2ee   : > { %v1675_v54 = vmul.f32 %v1673_v38, %v1670_v51  ;;  %1791 = vmatpush.msra.mxu3 %v1790_v30  ;;  %v1801_v51 = vsub.f32 %v4540_v56, %v1800_v31  ;;  %v1806_v38 = vand.u32 4294901760, %v4552_v23  ;;  %1882 = vmatpush.msrb.mxu1 %v4554_v27  ;;  %v1708_v56 = vld [vmem:[%s5156_s17 + $0x8] sm:$0xff] }
 0x2ef   : > { %1750 = vmatpush.msra.mxu2 %v4554_v27 }
 0x2f0   : > { %1677 = vrot.lane.b32.xlu2 %v1675_v54, %s3634_s3  ;;  %v4567_v54 = vsub.f32 %v1707_v33, %v4554_v27  ;;  %v1802_v37 = vand.u32 4294901760, %v1801_v51  ;;  %v1807_v42 = vsub.f32 %v4552_v23, %v1806_v38  ;;  %s5227_s3 = sld [smem:[#allocation4_spill]] }
 0x2f1   : > { %1901 = vmatpush.msrb.mxu2 %v1770_v62  ;;  %v4604_v62 = vand.u32 4294901760, %v1718_v4 }
 0x2f2   : > { %1852 = vmatpush.msrb.mxu0 %v4567_v54 }
 0x2f3   : > { %1905 = vmatpush.msrb.mxu2 %v1776_v17  ;;  %v2013_v17 = vand.u32 4294901760, %v4607_v1  ;;  %v4622_v39 = vsub.f32 %v1718_v4, %v4604_v62 }
 0x2f4   : > { %1684 = vperm.xlu0 %3579, %v1681_v12   ;;  %v1796_v12 = vand.u32 4294901760, %v1795_v36 }
 0x2f5   : > { %1909 = vmatpush.msrb.mxu2 %v1782_v40  ;;  %v2014_v35 = vsub.f32 %v4607_v1, %v2013_v17  ;;  %v2019_v63 = vand.u32 4294901760, %v4622_v39 }
 0x2f6   : > { %v1629_v13 = vpop.permute.xlu2 %1628  ;;  %1797 = vmatpush.msra.mxu3 %v1796_v12 }
 0x2f7   : > { %v1631_v6 = vmul.f32 %v1629_v13, %v1626_v47  ;;  %v1812_v47 = vand.u32 4294901760, %v4567_v54  ;;  %v1722_v13 = vld [vmem:[%s5156_s17 + $0x78] sm:$0xff]  ;;  %1913 = vmatpush.msrb.mxu2 %v1788_v34  ;;  %v2015_v33 = vand.u32 4294901760, %v2014_v35  ;;  %v2020_v30 = vsub.f32 %v4622_v39, %v2019_v63 }
 0x2f8   : > { %2531 = vperm.xlu2 %3578, %v4450_v61   ;;  %1803 = vmatpush.msra.mxu3 %v1802_v37 }
 0x2f9   : > { %v4453_v19 = vadd.f32 %v1631_v6, %v1616_v60  ;;  %v4581_v60 = vand.u32 4294901760, %v1722_v13  ;;  %v1808_v6 = vand.u32 4294901760, %v1807_v42  ;;  %v1813_v48 = vsub.f32 %v4567_v54, %v1812_v47  ;;  %1917 = vmatpush.msrb.mxu2 %v1794_v58 }
 0x2fa   : > { %v2021_v12 = vand.u32 4294901760, %v2020_v30 }
 0x2fb   : > { %1973 = vmatpush.msra.mxu0 %v4581_v60  ;;  %v4593_v2 = vsub.f32 %v1722_v13, %v4581_v60  ;;  %v1814_v53 = vand.u32 4294901760, %v1813_v48  ;;  %1809 = vmatpush.msra.mxu3 %v1808_v6  ;;  %v2031_v13 = vand.u32 4294901760, %v4656_v50  ;;  %v4681_v6 = vand.u32 4294901760, %v1708_v56 }
 0x2fc   : > { %1921 = vmatpush.msrb.mxu2 %v1800_v31 }
 0x2fd   : > { %1975 = vmatpush.msra.mxu0 %v4595_v15  ;;  %v2007_v14 = vand.u32 4294901760, %v4593_v2  ;;  %1815 = vmatpush.msra.mxu3 %v1814_v53  ;;  %v2032_v53 = vsub.f32 %v4656_v50, %v2031_v13 }
 0x2fe   : > { %1925 = vmatpush.msrb.mxu2 %v1806_v38 }
 0x2ff   : > { %v2008_v10 = vsub.f32 %v4593_v2, %v2007_v14  ;;  %1977 = vmatpush.msra.mxu0 %v4604_v62  ;;  %1944 = vmatpush.msrb.mxu3 %v4464_v24  ;;  %v4639_v24 = vsub.f32 %v1716_v25, %v4619_v28  ;;  %v4698_v25 = vsub.f32 %v1708_v56, %v4681_v6 }
 0x300   : > { %3582 = vset.pattern.permute.xlu2 %v3621_v55  ;;  %1929 = vmatpush.msrb.mxu2 %v1812_v47 }
 0x301   : > { %2550 = vperm.xlu2 %3582, %v4450_v61   ;;  %v2009_v40 = vand.u32 4294901760, %v2008_v10  ;;  %1979 = vmatpush.msra.mxu0 %v4619_v28  ;;  %v2025_v51 = vand.u32 4294901760, %v4639_v24  ;;  %v2033_v10 = vand.u32 4294901760, %v2032_v53 }
 0x302   : > { %1946 = vmatpush.msrb.mxu3 %v4472_v29  ;;  %v4651_v29 = vand.u32 4294901760, %v1712_v46 }
 0x303   : > { %2010 = vmatpush.msra.mxu1 %v2009_v40  ;;  %1981 = vmatpush.msra.mxu0 %v4635_v18  ;;  %v2026_v42 = vsub.f32 %v4639_v24, %v2025_v51  ;;  %v2049_v40 = vand.u32 4294901760, %v4698_v25 }
 0x304   : > { %1948 = vmatpush.msrb.mxu3 %v4484_v0  ;;  %v4667_v0 = vsub.f32 %v1712_v46, %v4651_v29 }
 0x305   : > { %2016 = vmatpush.msra.mxu1 %v2015_v33  ;;  %1983 = vmatpush.msra.mxu0 %v4651_v29  ;;  %v2027_v59 = vand.u32 4294901760, %v2026_v42  ;;  %v2050_v46 = vsub.f32 %v4698_v25, %v2049_v40 }
 0x306   : > { %1950 = vmatpush.msrb.mxu3 %v4499_v7  ;;  %v2037_v31 = vand.u32 4294901760, %v4667_v0 }
 0x307   : > { %2022 = vmatpush.msra.mxu1 %v2021_v12 }
 0x308   : > { %1952 = vmatpush.msrb.mxu3 %v4515_v20  ;;  %v2038_v38 = vsub.f32 %v4667_v0, %v2037_v31 }
 0x309   : > { %3583 = vset.pattern.permute.xlu2 %v3619_v44  ;;  %2028 = vmatpush.msra.mxu1 %v2027_v59 }
 0x30a   : > { %2569 = vperm.xlu2 %3583, %v4450_v61   ;;  %1954 = vmatpush.msrb.mxu3 %v4526_v49  ;;  %v2039_v54 = vand.u32 4294901760, %v2038_v38  ;;  %v2051_v49 = vand.u32 4294901760, %v2050_v46 }
 0x30b   : > { %2034 = vmatpush.msra.mxu1 %v2033_v10 }
 0x30c   : > { %1956 = vmatpush.msrb.mxu3 %v4542_v8 }
 0x30d   : > { %2040 = vmatpush.msra.mxu1 %v2039_v54 }
 0x30e   : > { %1958 = vmatpush.msrb.mxu3 %v4554_v27 }
 0x312   : > { %3584 = vset.pattern.permute.xlu2 %v3617_v5 }
 0x313   : > { %2588 = vperm.xlu2 %3584, %v4450_v61  }
 0x34a   : > { %v1678_v48 = vpop.permute.xlu2 %1677 }
 0x35e   : > { %v1646_v43 = vpop.permute.xlu0 %1645  ;;  %v1662_v36 = vpop.permute.xlu1 %1661 }
 0x35f   : > { %v1648_v34 = vadd.f32 %v1646_v43, %v4453_v19  ;;  %v1710_v19 = vld [vmem:[%s5156_s17 + $0x18] sm:$0xff] }
 0x360   : > { %v4664_v37 = vand.u32 4294901760, %v1710_v19 }
 0x361   : > { %v1664_v58 = vadd.f32 %v1662_v36, %v1648_v34 }
 0x362   : > { %1985 = vmatpush.msra.mxu0 %v4664_v37  ;;  %v4684_v7 = vsub.f32 %v1710_v19, %v4664_v37 }
 0x363   : > { %v1680_v23 = vadd.f32 %v1678_v48, %v1664_v58 }
 0x364   : > { %1987 = vmatpush.msra.mxu0 %v4681_v6  ;;  %v2043_v4 = vand.u32 4294901760, %v4684_v7 }
 0x366   : > { %v1685_v20 = vpop.permute.xlu0 %1684  ;;  %v2044_v47 = vsub.f32 %v4684_v7, %v2043_v4 }
 0x367   : > { %v1687_v9 = vadd.f32 %v1685_v20, %v1680_v23 }
 0x368   : > { %v2045_v43 = vand.u32 4294901760, %v2044_v47 }
 0x369   : > { %v3527_v35 = vmul.f32 -1.442695, %v1687_v9  ;;  %v2201_v9 = vld [vmem:[%s5227_s3] sm:$0xf]  ;;  %s5185_s3 = smov 111  }
 0x36a   : > { %2046 = vmatpush.msra.mxu1 %v2045_v43 }
 0x36b   : > { %3603 = vpow2.f32 %v3527_v35 }
 0x36c   : > { %2052 = vmatpush.msra.mxu1 %v2051_v49 }
 0x371   : > { %v3604_v34 = vpop.eup %3603 }
 0x372   : > { %v1691_v33 = vadd.f32 1.0, %v3604_v34 }
 0x374   : > { %3605 = vrcp.f32 %v1691_v33  ;;  %v1703_v19 = vand.u32 2147483648, %v1691_v33  ;;  %v1701_v12 = vand.u32 2147483647, %v1691_v33  ;;  %vm1697_vm6 = vweird.f32 %v1691_v33 }
 0x376   : > { %v1704_v27 = vor.u32 1.1754944e-38, %v1703_v19  ;;  %vm1702_vm9 = vcmp.eq.f32.partialorder %v1701_v12, 8.507059e+37 }
 0x37a   : > { %v3606_v30 = vpop.eup %3605 }
 0x37b   : > { %v1693_v36 = vmul.f32 %v3606_v30, %v1691_v33  ;;  %vm1698_vm5 = vweird.f32 %v3606_v30 }
 0x37c   : > { %vm1699_vm8 = vmor %vm1697_vm6, %vm1698_vm5 }
 0x37d   : > { %v1694_v8 = vsub.f32 1.0, %v1693_v36 }
 0x37f   : > { %v1695_v58 = vmul.f32 %v3606_v30, %v1694_v8 }
 0x381   : > { %v1696_v42 = vadd.f32 %v3606_v30, %v1695_v58 }
 0x383   : > { %v1700_v56 = vsel %vm1699_vm8, %v3606_v30, %v1696_v42 }
 0x384   : > { %v1705_v48 = vsel %vm1702_vm9, %v1704_v27, %v1700_v56 }
 0x385   : > { %v1725_v59 = vsel %vm1723_vm7, %v1705_v48, 0 }
 0x386   : > { %v1751_v53 = vand.u32 4294901760, %v1725_v59 }
 0x388   : > { %1817 = vmatmul.f32.vlgmr.msra.gmra.mxu3 %v1751_v53  ;;  %v1752_v23 = vsub.f32 %v1725_v59, %v1751_v53 }
 0x389   : > { %2105 = vmatpush.msra.mxu3 %v4581_v60 }
 0x38a   : > { %1855 = vmatmul.f32.vlgmr.msrb.gmra.mxu0 %v1752_v23  ;;  %v1753_v38 = vand.u32 4294901760, %v1752_v23 }
 0x38b   : > { %2107 = vmatpush.msra.mxu3 %v4595_v15  ;;  %2138 = vmatpush.msrb.mxu0 %v2007_v14 }
 0x38c   : > { %1886 = vmatmul.f32.vlgmr.msrb.gmra.mxu1 %v1753_v38  ;;  %v1754_v20 = vsub.f32 %v1752_v23, %v1753_v38 }
 0x38d   : > { %2109 = vmatpush.msra.mxu3 %v4604_v62  ;;  %2142 = vmatpush.msrb.mxu0 %v2013_v17 }
 0x38e   : > { %2181 = vmatpush.msrb.mxu1 %v4581_v60  ;;  %v1755_v10 = vand.u32 4294901760, %v1754_v20  ;;  %v2209_v60 = vsel %vm1380_vm0, %v2201_v9, 0 }
 0x38f   : > { %2111 = vmatpush.msra.mxu3 %v4619_v28  ;;  %2146 = vmatpush.msrb.mxu0 %v2019_v63 }
 0x390   : > { %2183 = vmatpush.msrb.mxu1 %v4595_v15  ;;  %1756 = vmatmul.f32.vlgmr.msra.gmra.mxu2 %v1755_v10 }
 0x391   : > { %1960 = vmatmul.f32.vlgmr.msrb.gmra.mxu3 %v1751_v53  ;;  %2068 = vmatpush.msra.mxu2 %v4593_v2  ;;  %v2228_v2 = vand.u32 4294901760, %v2209_v60 }
 0x392   : > { %2113 = vmatpush.msra.mxu3 %v4635_v18  ;;  %2150 = vmatpush.msrb.mxu0 %v2025_v51 }
 0x393   : > { %2185 = vmatpush.msrb.mxu1 %v4604_v62  ;;  %1993 = vmatmul.f32.vlgmr.msra.gmra.mxu0 %v1755_v10  ;;  %v2229_v15 = vsub.f32 %v2209_v60, %v2228_v2 }
 0x394   : > { %2071 = vmatpush.msra.mxu2 %v4607_v1  ;;  %2115 = vmatpush.msra.mxu3 %v4651_v29  ;;  %v2202_v1 = vld [vmem:[%s5228_s30] sm:$0xf]  ;;  %s5229_s30 = sld [smem:[#allocation7_spill]] }
 0x395   : > { %2154 = vmatpush.msrb.mxu0 %v2031_v13  ;;  %2187 = vmatpush.msrb.mxu1 %v4619_v28  ;;  %v2230_v14 = vand.u32 4294901760, %v2229_v15  ;;  %v3635_v28 = vmov 5  }
 0x396   : > { %2054 = vmatmul.f32.vlgmr.msra.gmra.mxu1 %v1751_v53  ;;  %2074 = vmatpush.msra.mxu2 %v4622_v39 }
 0x397   : > { %2117 = vmatpush.msra.mxu3 %v4664_v37  ;;  %2158 = vmatpush.msrb.mxu0 %v2037_v31  ;;  %v2231_v62 = vsub.f32 %v2229_v15, %v2230_v14 }
 0x398   : > { %2189 = vmatpush.msrb.mxu1 %v4635_v18  ;;  %2077 = vmatpush.msra.mxu2 %v4639_v24 }
 0x399   : > { %2119 = vmatpush.msra.mxu3 %v4681_v6  ;;  %2162 = vmatpush.msrb.mxu0 %v2043_v4 }
 0x39a   : > { %2191 = vmatpush.msrb.mxu1 %v4651_v29  ;;  %1931 = vmatmul.f32.vlgmr.msrb.gmra.mxu2 %v1751_v53 }
 0x39b   : > { %2123 = vmatmul.f32.vlgmr.msra.gmra.mxu3 %v1753_v38  ;;  %2080 = vmatpush.msra.mxu2 %v4656_v50 }
 0x39c   : > { %2166 = vmatpush.msrb.mxu0 %v2049_v40  ;;  %2193 = vmatpush.msrb.mxu1 %v4664_v37 }
 0x39d   : > { %2168 = vmatmul.f32.vlgmr.msrb.gmra.mxu0 %v1751_v53  ;;  %2083 = vmatpush.msra.mxu2 %v4667_v0 }
 0x39e   : > { %2195 = vmatpush.msrb.mxu1 %v4681_v6  ;;  %2257 = vmatpush.msrb.mxu3 %v4276_v26 }
 0x39f   : > { %2197 = vmatmul.f32.vlgmr.msrb.gmra.mxu1 %v1751_v53  ;;  %2086 = vmatpush.msra.mxu2 %v4684_v7 }
 0x3a0   : > { %2280 = vmatpush.msra.mxu0 %v4207_v45  ;;  %2303 = vmatpush.msra.mxu1 %v4180_v21  ;;  %v2232_v45 = vand.u32 4294901760, %v2231_v62  ;;  %v3642_v62 = vmov 7  }
 0x3a1   : > { %2089 = vmatpush.msra.mxu2 %v4698_v25  ;;  %2351 = vmatpush.msra.mxu3 %v4180_v21 }
 0x3a2   : > { %2092 = vmatmul.f32.vlgmr.msra.gmra.mxu2 %v1752_v23  ;;  %2373 = vmatpush.msrb.mxu0 %v4262_v32 }
 0x3a3   : > { %2227 = vmatpush.msrb.mxu2 %v4180_v21  ;;  %2259 = vmatmul.f32.vlgmr.msrb.gmra.mxu3 %v2228_v2 }
 0x3a4   : > { %2403 = vmatpush.msrb.mxu1 %v4317_v3  ;;  %2205 = vperm.xlu1 %3580, %v2202_v1   ;;  %v2671_v1 = vld [vmem:[%s5229_s30] sm:$0xf] }
 0x3a5   : > { %2329 = vmatpush.msra.mxu2 %v4235_v22  ;;  %2283 = vmatmul.f32.vlgmr.msra.gmra.mxu0 %v2229_v15 }
 0x3a6   : > { %2449 = vmatpush.msrb.mxu3 %v4262_v32  ;;  %2475 = vmatpush.msra.mxu0 %v4298_v41 }
 0x3a7   : > { %2307 = vmatmul.f32.vlgmr.msra.gmra.mxu1 %v2230_v14  ;;  %3585 = vset.pattern.permute.xlu2 %v3635_v28 }
 0x3a8   : > { %2497 = vmatpush.msra.mxu1 %v4262_v32  ;;  %2607 = vperm.xlu2 %3585, %v4450_v61  }
 0x3aa   : > { %2233 = vmatmul.f32.vlgmr.msrb.gmra.mxu2 %v2232_v45 }
 0x3ab   : > { %2353 = vmatmul.f32.vlgmr.msra.gmra.mxu3 %v2228_v2  ;;  %2426 = vmatpush.msrb.mxu2 %v4283_v52 }
 0x3ac   : > { %3581 = vset.pattern.permute.xlu1 %v3622_v57 }
 0x3ad   : > { %2379 = vmatmul.f32.vlgmr.msrb.gmra.mxu0 %v2232_v45  ;;  %2512 = vperm.xlu1 %3581, %v4450_v61   ;;  %v2532_v45 = vpop.permute.xlu2 %2531 }
 0x3af   : > { %2405 = vmatmul.f32.vlgmr.msrb.gmra.mxu1 %v2228_v2 }
 0x3b2   : > { %2331 = vmatmul.f32.vlgmr.msra.gmra.mxu2 %v2228_v2 }
 0x3b3   : > { %2453 = vmatmul.f32.vlgmr.msrb.gmra.mxu3 %v2230_v14  ;;  %v3641_v14 = vmov 6  }
 0x3b4   : > { %3586 = vset.pattern.permute.xlu2 %v3641_v14 }
 0x3b5   : > { %2477 = vmatmul.f32.vlgmr.msra.gmra.mxu0 %v2228_v2  ;;  %3589 = vset.pattern.permute.xlu1 %v3616_v16 }
 0x3b7   : > { %2499 = vmatmul.f32.vlgmr.msra.gmra.mxu1 %v2228_v2 }
 0x3ba   : > { %2429 = vmatmul.f32.vlgmr.msrb.gmra.mxu2 %v2229_v15  ;;  %v3639_v15 = vmov 8  }
 0x3bb   : > { %3588 = vset.pattern.permute.xlu0 %v3639_v15 }
 0x407   : > { %v1856_v21 = vpop.f32.mrf.mxu0 }
 0x409   : > { %v1887_v22 = vpop.f32.mrf.mxu1 }
 0x40b   : > { %v1818_v32 = vpop.f32.mrf.mxu3 }
 0x410   : > { %v1994_v26 = vpop.f32.mrf.mxu0 }
 0x413   : > { %v2055_v41 = vpop.f32.mrf.mxu1  ;;  %v1757_v3 = vpop.f32.mrf.mxu2 }
 0x414   : > { %v2056_v52 = vadd.f32 %v2055_v41, %v1994_v26  ;;  %v1819_v17 = vadd.f32 %v1818_v32, %v1757_v3  ;;  %v1961_v63 = vpop.f32.mrf.mxu3 }
 0x416   : > { %v1857_v39 = vadd.f32 %v1856_v21, %v1819_v17  ;;  %v2206_v25 = vpop.permute.xlu1 %2205  ;;  %v2551_v21 = vpop.permute.xlu2 %2550 }
 0x418   : > { %v1888_v18 = vadd.f32 %v1887_v22, %v1857_v39  ;;  %v2521_v39 = vlaneseq }
 0x41a   : > { %v2169_v37 = vpop.f32.mrf.mxu0 }
 0x41c   : > { %v2198_v31 = vpop.f32.mrf.mxu1 }
 0x41d   : > { %v1932_v24 = vpop.f32.mrf.mxu2 }
 0x41e   : > { %v1933_v29 = vadd.f32 %v1932_v24, %v1888_v18  ;;  %v2124_v50 = vpop.f32.mrf.mxu3  ;;  %v2570_v22 = vpop.permute.xlu2 %2569  ;;  %v4840_v18 = vand.u32 127, %v2521_v39 }
 0x41f   : > { %v2513_v26 = vpop.permute.xlu1 %2512 }
 0x420   : > { %v4774_v51 = vadd.f32 %v1961_v63, %v1933_v29  ;;  %v4845_v29 = vld [vmem:[%s5157_s18] sm:$0xff]  ;;  %vm2523_vm10 = vcmp.lt.s32.totalorder %v4840_v18, 17  ;;  %vm2561_vm11 = vcmp.lt.s32.totalorder %v4840_v18, 15  ;;  %vm2542_vm12 = vcmp.lt.s32.totalorder %v4840_v18, 16 }
 0x421   : > { %vm2580_vm13 = vcmp.lt.s32.totalorder %v4840_v18, 1  ;;  %vm2599_vm14 = vcmp.lt.s32.totalorder %v4840_v18, 127  ;;  %v2602_v39 = vperm.slane %v4845_v29, 5  ;;  %vm2618_vm15 = vcmp.lt.s32.totalorder %v4840_v18, 113 }
 0x422   : > { %v2284_v54 = vpop.f32.mrf.mxu0  ;;  %vm2637_vm0 = vcmp.lt.s32.totalorder %v4840_v18, 112  ;;  %vm2656_vm2 = vcmp.lt.s32.totalorder %v4840_v18, 111 }
 0x424   : > { %v2308_v43 = vpop.f32.mrf.mxu1 }
 0x425   : > { %v2093_v0 = vpop.f32.mrf.mxu2 }
 0x426   : > { %v2094_v13 = vadd.f32 %v2093_v0, %v2056_v52  ;;  %v2260_v7 = vpop.f32.mrf.mxu3  ;;  %v4834_v3 = vpop.permute.xlu2 %2588 }
 0x428   : > { %v2125_v6 = vadd.f32 %v2124_v50, %v2094_v13  ;;  %v4850_v50 = vld [vmem:[%s5157_s18 + $0x8] sm:$0xff] }
 0x429   : > { %v2527_v0 = vperm.slane %v4850_v50, 0 }
 0x42a   : > { %v2170_v4 = vadd.f32 %v2169_v37, %v2125_v6  ;;  %v2380_v36 = vpop.f32.mrf.mxu0  ;;  %v2526_v37 = vperm.slane %v4845_v29, 0 }
 0x42b   : > { %v2381_v19 = vadd.f32 %v2380_v36, %v2206_v25 }
 0x42c   : > { %v4776_v47 = vadd.f32 %v2198_v31, %v2170_v4  ;;  %v2406_v12 = vpop.f32.mrf.mxu1 }
 0x42d   : > { %v2234_v40 = vpop.f32.mrf.mxu2  ;;  %v2407_v27 = vadd.f32 %v2406_v12, %v2381_v19 }
 0x42e   : > { %v2235_v35 = vadd.f32 %v2234_v40, %v2206_v25  ;;  %v2354_v34 = vpop.f32.mrf.mxu3  ;;  %v4836_v17 = vpop.permute.xlu2 %2607  ;;  %v2546_v40 = vperm.slane %v4850_v50, 1 }
 0x430   : > { %v2261_v46 = vadd.f32 %v2260_v7, %v2235_v35 }
 0x432   : > { %v2285_v49 = vadd.f32 %v2284_v54, %v2261_v46  ;;  %v2478_v23 = vpop.f32.mrf.mxu0  ;;  %v2545_v54 = vperm.slane %v4845_v29, 1  ;;  %v2565_v46 = vperm.slane %v4850_v50, 2 }
 0x434   : > { %v2309_v33 = vadd.f32 %v2308_v43, %v2285_v49  ;;  %v2500_v20 = vpop.f32.mrf.mxu1  ;;  %v2564_v43 = vperm.slane %v4845_v29, 2 }
 0x435   : > { %v2332_v30 = vpop.f32.mrf.mxu2 }
 0x436   : > { %v2333_v8 = vadd.f32 %v2332_v30, %v2309_v33  ;;  %v2454_v59 = vpop.f32.mrf.mxu3 }
 0x438   : > { %v2355_v58 = vadd.f32 %v2354_v34, %v2333_v8 }
 0x43a   : > { %v4778_v42 = vmax.f32 %v2355_v58, 0.0 }
 0x43c   : > { %2557 = vrot.lane.b32.xlu0 %v4778_v42, %s3636_s5  ;;  %2517 = vrot.lane.b32.xlu2 %v4778_v42, %s3637_s1  ;;  %v4786_v56 = vmul.f32 %v4778_v42, %v4774_v51  ;;  %v2515_v8 = vmul.f32 %v2513_v26, %v4778_v42 }
 0x43d   : > { %v2430_v48 = vpop.f32.mrf.mxu2 }
 0x43e   : > { %v2431_v53 = vadd.f32 %v2430_v48, %v2407_v27 }
 0x440   : > { %v2455_v38 = vadd.f32 %v2454_v59, %v2431_v53  ;;  %v2583_v53 = vperm.slane %v4845_v29, 3 }
 0x442   : > { %v2479_v10 = vadd.f32 %v2478_v23, %v2455_v38  ;;  %v2584_v23 = vperm.slane %v4850_v50, 3 }
 0x444   : > { %v2501_v9 = vadd.f32 %v2500_v20, %v2479_v10  ;;  %2576 = vrot.lane.b32.xlu0 %v4778_v42, %s3620_s0  ;;  %2538 = vrot.lane.b32.xlu2 %v4778_v42, %s3631_s24 }
 0x446   : > { %v4792_v60 = vmax.f32 %v2501_v9, 0.0 }
 0x448   : > { %2519 = vrot.lane.b32.xlu1 %v4792_v60, %s3637_s1  ;;  %v4798_v2 = vmul.f32 %v4792_v60, %v4776_v47  ;;  %v2516_v12 = vmul.f32 %v2513_v26, %v4792_v60 }
 0x44c   : > { %2595 = vrot.lane.b32.xlu0 %v4778_v42, %s3626_s23  ;;  %2626 = vperm.xlu2 %3586, %v4450_v61  }
 0x450   : > { %2559 = vrot.lane.b32.xlu1 %v4792_v60, %s3636_s5 }
 0x454   : > { %2614 = vrot.lane.b32.xlu0 %v4778_v42, %s3638_s26  ;;  %3587 = vset.pattern.permute.xlu2 %v3642_v62 }
 0x455   : > { %2645 = vperm.xlu2 %3587, %v4450_v61  }
 0x458   : > { %2578 = vrot.lane.b32.xlu1 %v4792_v60, %s3620_s0 }
 0x45c   : > { %2633 = vrot.lane.b32.xlu0 %v4778_v42, %s3640_s27 }
 0x45d   : > { %3590 = vset.pattern.permute.xlu2 %v3616_v16 }
 0x460   : > { %2597 = vrot.lane.b32.xlu1 %v4792_v60, %s3626_s23 }
 0x464   : > { %2540 = vrot.lane.b32.xlu0 %v4792_v60, %s3631_s24 }
 0x468   : > { %2616 = vrot.lane.b32.xlu1 %v4792_v60, %s3638_s26 }
 0x46c   : > { %2652 = vrot.lane.b32.xlu0 %v4778_v42, %s5185_s3 }
 0x470   : > { %2635 = vrot.lane.b32.xlu1 %v4792_v60, %s3640_s27 }
 0x474   : > { %2664 = vperm.xlu0 %3588, %v4450_v61  }
 0x478   : > { %2654 = vrot.lane.b32.xlu1 %v4792_v60, %s5185_s3 }
 0x47c   : > { %3596 = vset.pattern.permute.xlu0 %v3635_v28 }
 0x480   : > { %2674 = vperm.xlu1 %3589, %v2671_v1  }
 0x488   : > { %3591 = vset.pattern.permute.xlu1 %v3622_v57 }
 0x496   : > { %v2518_v57 = vpop.permute.xlu2 %2517 }
 0x49e   : > { %v2539_v35 = vpop.permute.xlu2 %2538 }
 0x4ae   : > { %v2558_v32 = vpop.permute.xlu0 %2557 }
 0x4b6   : > { %v2577_v41 = vpop.permute.xlu0 %2576 }
 0x4ba   : > { %v2520_v61 = vpop.permute.xlu1 %2519 }
 0x4bb   : > { %v2524_v31 = vsel %vm2523_vm10, %v2518_v57, %v2520_v61  ;;  %v2525_v6 = vsel %vm2523_vm10, %v2520_v61, %v2518_v57  ;;  %v2603_v57 = vperm.slane %v4850_v50, 5 }
 0x4bc   : > { %v2528_v7 = vmul.f32 %v2526_v37, %v2525_v6  ;;  %v2529_v4 = vmul.f32 %v2527_v0, %v2524_v31  ;;  %v2627_v31 = vpop.permute.xlu2 %2626 }
 0x4be   : > { %v2596_v52 = vpop.permute.xlu0 %2595  ;;  %v2534_v49 = vmul.f32 %v2532_v45, %v2528_v7  ;;  %v2535_v34 = vmul.f32 %v2532_v45, %v2529_v4  ;;  %v2621_v4 = vperm.slane %v4845_v29, 6 }
 0x4c0   : > { %v2536_v38 = vadd.f32 %v2534_v49, %v2515_v8  ;;  %v2537_v20 = vadd.f32 %v2535_v34, %v2516_v12  ;;  %v2622_v34 = vperm.slane %v4850_v50, 6  ;;  %v2692_v8 = vld [vmem:[%s5151_s12] sm:$0xf] }
 0x4c2   : > { %v2560_v28 = vpop.permute.xlu1 %2559 }
 0x4c3   : > { %v2562_v33 = vsel %vm2561_vm11, %v2558_v32, %v2560_v28  ;;  %v2563_v30 = vsel %vm2561_vm11, %v2560_v28, %v2558_v32 }
 0x4c4   : > { %v2566_v59 = vmul.f32 %v2564_v43, %v2563_v30  ;;  %v2567_v42 = vmul.f32 %v2565_v46, %v2562_v33  ;;  %v2640_v33 = vperm.slane %v4845_v29, 7  ;;  %v2641_v30 = vperm.slane %v4850_v50, 7 }
 0x4c6   : > { %v4838_v63 = vpop.permute.xlu0 %2614  ;;  %v2572_v61 = vmul.f32 %v2570_v22, %v2566_v59  ;;  %v2573_v28 = vmul.f32 %v2570_v22, %v2567_v42 }
 0x4ca   : > { %v2579_v24 = vpop.permute.xlu1 %2578 }
 0x4cb   : > { %v2581_v1 = vsel %vm2580_vm13, %v2577_v41, %v2579_v24  ;;  %v2582_v45 = vsel %vm2580_vm13, %v2579_v24, %v2577_v41 }
 0x4cc   : > { %v2586_v6 = vmul.f32 %v2584_v23, %v2581_v1 }
 0x4ce   : > { %v4855_v13 = vpop.permute.xlu0 %2633 }
 0x4d2   : > { %v2598_v25 = vpop.permute.xlu1 %2597 }
 0x4d3   : > { %v2600_v41 = vsel %vm2599_vm14, %v2596_v52, %v2598_v25  ;;  %v2601_v24 = vsel %vm2599_vm14, %v2598_v25, %v2596_v52  ;;  %v2592_v25 = vmul.f32 %v4834_v3, %v2586_v6 }
 0x4d4   : > { %v2605_v49 = vmul.f32 %v2603_v57, %v2601_v24 }
 0x4d6   : > { %v2541_v36 = vpop.permute.xlu0 %2540 }
 0x4d7   : > { %v2543_v19 = vsel %vm2542_vm12, %v2539_v35, %v2541_v36  ;;  %v2544_v58 = vsel %vm2542_vm12, %v2541_v36, %v2539_v35  ;;  %v2604_v35 = vmul.f32 %v2602_v39, %v2600_v41 }
 0x4d8   : > { %v2547_v27 = vmul.f32 %v2545_v54, %v2544_v58  ;;  %v2548_v48 = vmul.f32 %v2546_v40, %v2543_v19 }
 0x4d9   : > { %v2610_v42 = vmul.f32 %v4836_v17, %v2604_v35 }
 0x4da   : > { %v2553_v10 = vmul.f32 %v2551_v21, %v2547_v27  ;;  %v2554_v9 = vmul.f32 %v2551_v21, %v2548_v48  ;;  %v2617_v60 = vpop.permute.xlu1 %2616  ;;  %v2585_v21 = vmul.f32 %v2583_v53, %v2582_v45 }
 0x4db   : > { %v2619_v19 = vsel %vm2618_vm15, %v4838_v63, %v2617_v60  ;;  %v2620_v58 = vsel %vm2618_vm15, %v2617_v60, %v4838_v63  ;;  %v2646_v60 = vpop.permute.xlu2 %2645 }
 0x4dc   : > { %v2555_v32 = vadd.f32 %v2553_v10, %v2536_v38  ;;  %v2556_v26 = vadd.f32 %v2554_v9, %v2537_v20  ;;  %v2591_v52 = vmul.f32 %v4834_v3, %v2585_v21  ;;  %v2611_v38 = vmul.f32 %v4836_v17, %v2605_v49  ;;  %v4949_v17 = vld [vmem:[%s5157_s18 + $0x10] ss:$0 sm:$0xff] }
 0x4dd   : > { %v2695_v20 = vsel %vm2693_vm1, %v2692_v8, 0  ;;  %v2623_v63 = vmul.f32 %v2621_v4, %v2619_v19  ;;  %v2624_v10 = vmul.f32 %v2622_v34, %v2620_v58 }
 0x4de   : > { %v2574_v22 = vadd.f32 %v2572_v61, %v2555_v32  ;;  %v2575_v7 = vadd.f32 %v2573_v28, %v2556_v26  ;;  %v2653_v12 = vpop.permute.xlu0 %2652  ;;  %v4954_v32 = vld [vmem:[%s5157_s18 + $0x18] ss:$0 sm:$0xff]  ;;  %v4956_v26 = vand.u32 4294901760, %v2695_v20 }
 0x4df   : > { %v2629_v61 = vmul.f32 %v2627_v31, %v2623_v63  ;;  %v2630_v28 = vmul.f32 %v2627_v31, %v2624_v10 }
 0x4e0   : > { %v2594_v48 = vadd.f32 %v2592_v25, %v2575_v7  ;;  %v2593_v59 = vadd.f32 %v2591_v52, %v2574_v22 }
 0x4e2   : > { %v2636_v36 = vpop.permute.xlu1 %2635  ;;  %v2613_v1 = vadd.f32 %v2611_v38, %v2594_v48  ;;  %v2612_v45 = vadd.f32 %v2610_v42, %v2593_v59  ;;  %v2685_v38 = vrot.slane %v4774_v51, 4  ;;  %v2691_v51 = vld [vmem:[%s5150_s11] sm:$0xf] }
 0x4e3   : > { %v2638_v3 = vsel %vm2637_vm0, %v4855_v13, %v2636_v36  ;;  %v2639_v27 = vsel %vm2637_vm0, %v2636_v36, %v4855_v13  ;;  %v4965_v36 = vsub.f32 %v2695_v20, %v4956_v26 }
 0x4e4   : > { %v2642_v9 = vmul.f32 %v2640_v33, %v2638_v3  ;;  %v2643_v13 = vmul.f32 %v2641_v30, %v2639_v27  ;;  %v2631_v35 = vadd.f32 %v2629_v61, %v2612_v45  ;;  %v2632_v49 = vadd.f32 %v2630_v28, %v2613_v1 }
 0x4e5   : > { %v4968_v48 = vand.u32 4294901760, %v4965_v36  ;;  %v3000_v28 = vsel %vm2697_vm3, %v4786_v56, 0 }
 0x4e6   : > { %v2648_v21 = vmul.f32 %v2646_v60, %v2642_v9  ;;  %v2649_v6 = vmul.f32 %v2646_v60, %v2643_v13  ;;  %v2665_v7 = vpop.permute.xlu0 %2664  ;;  %v2686_v9 = vrot.slane %v4776_v47, 4 }
 0x4e7   : > { %v2724_v20 = vsub.f32 %v4965_v36, %v4968_v48 }
 0x4e8   : > { %v2650_v31 = vadd.f32 %v2648_v21, %v2631_v35  ;;  %v2651_v8 = vadd.f32 %v2649_v6, %v2632_v49  ;;  %v2997_v49 = vsel %vm2693_vm1, %v2691_v51, 0 }
 0x4e9   : > { %v2725_v61 = vand.u32 4294901760, %v2724_v20  ;;  %v4993_v20 = vld [vmem:[%s5153_s14] sm:$0xf] }
 0x4ea   : > { %v2655_v41 = vpop.permute.xlu1 %2654  ;;  %3308 = vperm.xlu1 %3591, %v4993_v20   ;;  %3386 = vperm.xlu0 %3596, %v4993_v20  }
 0x4eb   : > { %v2657_v24 = vsel %vm2656_vm2, %v2653_v12, %v2655_v41  ;;  %v2658_v22 = vsel %vm2656_vm2, %v2655_v41, %v2653_v12  ;;  %v3003_v41 = vsel %vm2697_vm3, %v4798_v2, 0 }
 0x4ec   : > { %v2661_v52 = vmul.f32 %v4949_v17, %v2657_v24  ;;  %v2662_v25 = vmul.f32 %v4954_v32, %v2658_v22  ;;  %v3020_v22 = vand.u32 4294901760, %v3000_v28 }
 0x4ee   : > { %v2667_v19 = vmul.f32 %v2665_v7, %v2661_v52  ;;  %v2668_v58 = vmul.f32 %v2665_v7, %v2662_v25  ;;  %v4980_v7 = vand.u32 4294901760, %v3003_v41  ;;  %v3047_v25 = vsub.f32 %v3000_v28, %v3020_v22 }
 0x4f0   : > { %v2669_v3 = vadd.f32 %v2667_v19, %v2650_v31  ;;  %v2670_v27 = vadd.f32 %v2668_v58, %v2651_v8  ;;  %v3193_v31 = vsub.f32 %v3003_v41, %v4980_v7  ;;  %v3022_v8 = vand.u32 4294901760, %v2997_v49 }
 0x4f2   : > { %v2675_v12 = vpop.permute.xlu1 %2674  ;;  %3592 = vset.pattern.permute.xlu1 %v3616_v16  ;;  %3600 = vset.pattern.permute.xlu0 %v3616_v16 }
 0x4f3   : > { %v2677_v59 = vadd.f32 %v2675_v12, %v2669_v3  ;;  %v2678_v42 = vadd.f32 %v2675_v12, %v2670_v27  ;;  %v3048_v3 = vand.u32 4294901760, %v3047_v25  ;;  %v3194_v27 = vand.u32 4294901760, %v3193_v31  ;;  %3322 = vperm.xlu1 %3592, %v4993_v20  }
 0x4f4   : > { %v3023_v12 = vsub.f32 %v2997_v49, %v3022_v8 }
 0x4f5   : > { %v2679_v63 = vmax.f32 %v2677_v59, 0.0  ;;  %v2680_v10 = vmax.f32 %v2678_v42, 0.0  ;;  %v3049_v59 = vsub.f32 %v3047_v25, %v3048_v3  ;;  %v3195_v42 = vsub.f32 %v3193_v31, %v3194_v27 }
 0x4f7   : > { %v2689_v13 = vmul.f32 %v2685_v38, %v2679_v63  ;;  %v2690_v60 = vmul.f32 %v2686_v9, %v2680_v10  ;;  %v3024_v38 = vand.u32 4294901760, %v3023_v12  ;;  %v3050_v63 = vand.u32 4294901760, %v3049_v59 }
 0x4f8   : > { %v3196_v10 = vand.u32 4294901760, %v3195_v42 }
 0x4f9   : > { %v2699_v1 = vsel %vm2697_vm3, %v2689_v13, 0  ;;  %v2702_v45 = vsel %vm2697_vm3, %v2690_v60, 0  ;;  %v3025_v9 = vsub.f32 %v3023_v12, %v3024_v38  ;;  %v3297_v13 = vld [vmem:[%s5152_s13] sm:$0xf] }
 0x4fa   : > { %v2719_v21 = vand.u32 4294901760, %v2699_v1  ;;  %v2865_v6 = vand.u32 4294901760, %v2702_v45  ;;  %3300 = vperm.xlu2 %3590, %v3297_v13   ;;  %v5033_v13 = vld [vmem:[%s4135_s22] sm:$0xff] }
 0x4fb   : > { %3593 = vset.pattern.permute.xlu1 %v3621_v55 }
 0x4fc   : > { %v2746_v47 = vsub.f32 %v2699_v1, %v2719_v21  ;;  %v2892_v24 = vsub.f32 %v2702_v45, %v2865_v6  ;;  %2720 = vmatpush.msra.mxu2 %v2719_v21  ;;  %2796 = vmatpush.msrb.mxu1 %v2719_v21 }
 0x4fd   : > { %2726 = vmatmul.f32.vlgmr.msra.gmra.mxu2 %v2725_v61  ;;  %2800 = vmatmul.f32.vlgmr.msrb.gmra.mxu1 %v4968_v48 }
 0x4fe   : > { %2773 = vmatpush.msrb.mxu0 %v2746_v47  ;;  %v2747_v56 = vand.u32 4294901760, %v2746_v47  ;;  %v2893_v35 = vand.u32 4294901760, %v2892_v24  ;;  %3338 = vperm.xlu1 %3593, %v4993_v20  }
 0x4ff   : > { %2776 = vmatmul.f32.vlgmr.msrb.gmra.mxu0 %v4965_v36 }
 0x500   : > { %2866 = vmatpush.msra.mxu0 %v2865_v6  ;;  %2822 = vmatpush.msrb.mxu2 %v2747_v56  ;;  %v2748_v2 = vsub.f32 %v2746_v47, %v2747_v56  ;;  %v2894_v52 = vsub.f32 %v2892_v24, %v2893_v35 }
 0x502   : > { %2968 = vmatpush.msrb.mxu0 %v2893_v35  ;;  %2919 = vmatpush.msra.mxu2 %v2892_v24  ;;  %v2749_v19 = vand.u32 4294901760, %v2748_v2  ;;  %v2895_v58 = vand.u32 4294901760, %v2894_v52 }
 0x503   : > { %3599 = vset.pattern.permute.xlu2 %v3639_v15 }
 0x504   : > { %2750 = vmatpush.msra.mxu3 %v2749_v19  ;;  %2896 = vmatpush.msra.mxu1 %v2895_v58 }
 0x505   : > { %2752 = vmatmul.f32.vlgmr.msra.gmra.mxu3 %v4956_v26  ;;  %2824 = vmatmul.f32.vlgmr.msrb.gmra.mxu2 %v4956_v26 }
 0x506   : > { %2844 = vmatpush.msrb.mxu3 %v2719_v21  ;;  %2898 = vmatmul.f32.vlgmr.msra.gmra.mxu1 %v4956_v26 }
 0x507   : > { %2990 = vmatpush.msrb.mxu1 %v2865_v6  ;;  %3021 = vmatpush.msrb.mxu2 %v3020_v22 }
 0x508   : > { %2942 = vmatpush.msra.mxu3 %v2865_v6  ;;  %2872 = vmatmul.f32.vlgmr.msra.gmra.mxu0 %v2725_v61 }
 0x509   : > { %3097 = vmatpush.msra.mxu1 %v3020_v22  ;;  %3074 = vmatpush.msra.mxu0 %v3047_v25 }
 0x50a   : > { %3594 = vset.pattern.permute.xlu1 %v3619_v44 }
 0x50b   : > { %3354 = vperm.xlu1 %3594, %v4993_v20  }
 0x50d   : > { %2846 = vmatmul.f32.vlgmr.msrb.gmra.mxu3 %v4956_v26  ;;  %2922 = vmatmul.f32.vlgmr.msra.gmra.mxu2 %v4965_v36  ;;  %v3026_v36 = vand.u32 4294901760, %v3025_v9 }
 0x50e   : > { %2992 = vmatmul.f32.vlgmr.msrb.gmra.mxu1 %v4956_v26  ;;  %3051 = vmatpush.msrb.mxu3 %v3050_v63 }
 0x50f   : > { %3123 = vmatpush.msra.mxu2 %v3048_v3  ;;  %3197 = vmatpush.msrb.mxu1 %v3196_v10 }
 0x510   : > { %2970 = vmatmul.f32.vlgmr.msrb.gmra.mxu0 %v4956_v26 }
 0x511   : > { %3167 = vmatpush.msrb.mxu0 %v4980_v7 }
 0x513   : > { %3595 = vset.pattern.permute.xlu1 %v3617_v5 }
 0x514   : > { %3370 = vperm.xlu1 %3595, %v4993_v20  }
 0x515   : > { %2946 = vmatmul.f32.vlgmr.msra.gmra.mxu3 %v4968_v48  ;;  %3027 = vmatmul.f32.vlgmr.msrb.gmra.mxu2 %v3026_v36 }
 0x516   : > { %3101 = vmatmul.f32.vlgmr.msra.gmra.mxu1 %v3024_v38  ;;  %3145 = vmatpush.msra.mxu3 %v3020_v22 }
 0x517   : > { %3220 = vmatpush.msrb.mxu2 %v3193_v31  ;;  %3291 = vmatpush.msra.mxu1 %v4980_v7 }
 0x518   : > { %3077 = vmatmul.f32.vlgmr.msra.gmra.mxu0 %v3023_v12 }
 0x519   : > { %3269 = vmatpush.msra.mxu0 %v3194_v27 }
 0x51c   : > { %3597 = vset.pattern.permute.xlu1 %v3641_v14 }
 0x51d   : > { %3053 = vmatmul.f32.vlgmr.msrb.gmra.mxu3 %v3022_v8  ;;  %3125 = vmatmul.f32.vlgmr.msra.gmra.mxu2 %v3022_v8 }
 0x51e   : > { %3243 = vmatpush.msrb.mxu3 %v4980_v7  ;;  %3199 = vmatmul.f32.vlgmr.msrb.gmra.mxu1 %v3022_v8 }
 0x51f   : > { %3402 = vperm.xlu1 %3597, %v4993_v20  }
 0x520   : > { %3173 = vmatmul.f32.vlgmr.msrb.gmra.mxu0 %v3026_v36 }
 0x525   : > { %3147 = vmatmul.f32.vlgmr.msra.gmra.mxu3 %v3022_v8  ;;  %3223 = vmatmul.f32.vlgmr.msrb.gmra.mxu2 %v3023_v12 }
 0x526   : > { %3293 = vmatmul.f32.vlgmr.msra.gmra.mxu1 %v3022_v8 }
 0x527   : > { %3598 = vset.pattern.permute.xlu1 %v3642_v62 }
 0x528   : > { %3271 = vmatmul.f32.vlgmr.msra.gmra.mxu0 %v3022_v8 }
 0x52d   : > { %3247 = vmatmul.f32.vlgmr.msrb.gmra.mxu3 %v3024_v38 }
 0x554   : > { %v3301_v12 = vpop.permute.xlu2 %3300 }
 0x57a   : > { %v2801_v15 = vpop.f32.mrf.mxu1 }
 0x57c   : > { %v2777_v16 = vpop.f32.mrf.mxu0 }
 0x580   : > { %v2727_v55 = vpop.f32.mrf.mxu2 }
 0x583   : > { %v2899_v44 = vpop.f32.mrf.mxu1 }
 0x585   : > { %v2873_v26 = vpop.f32.mrf.mxu0 }
 0x586   : > { %v2900_v41 = vadd.f32 %v2899_v44, %v2873_v26 }
 0x588   : > { %v2753_v48 = vpop.f32.mrf.mxu3  ;;  %v2825_v60 = vpop.f32.mrf.mxu2 }
 0x589   : > { %v2754_v1 = vadd.f32 %v2753_v48, %v2727_v55 }
 0x58b   : > { %v2778_v28 = vadd.f32 %v2777_v16, %v2754_v1  ;;  %v2993_v6 = vpop.f32.mrf.mxu1 }
 0x58d   : > { %v2971_v5 = vpop.f32.mrf.mxu0  ;;  %v2802_v21 = vadd.f32 %v2801_v15, %v2778_v28  ;;  %v3309_v28 = vpop.permute.xlu1 %3308 }
 0x58f   : > { %v2826_v47 = vadd.f32 %v2825_v60, %v2802_v21 }
 0x590   : > { %v2847_v45 = vpop.f32.mrf.mxu3  ;;  %v2923_v61 = vpop.f32.mrf.mxu2 }
 0x591   : > { %v2924_v24 = vadd.f32 %v2923_v61, %v2900_v41  ;;  %v2848_v22 = vadd.f32 %v2847_v45, %v2826_v47  ;;  %v3441_v61 = vld [vmem:[%s5154_s15] sm:$0xf] }
 0x593   : > { %v3102_v35 = vpop.f32.mrf.mxu1 }
 0x595   : > { %v3078_v62 = vpop.f32.mrf.mxu0  ;;  %v3323_v21 = vpop.permute.xlu1 %3322 }
 0x598   : > { %v2947_v14 = vpop.f32.mrf.mxu3  ;;  %v3028_v51 = vpop.f32.mrf.mxu2 }
 0x599   : > { %v2948_v7 = vadd.f32 %v2947_v14, %v2924_v24  ;;  %v3029_v56 = vadd.f32 %v3028_v51, %v2848_v22  ;;  %v3387_v51 = vpop.permute.xlu0 %3386 }
 0x59b   : > { %v2972_v2 = vadd.f32 %v2971_v5, %v2948_v7  ;;  %v3200_v38 = vpop.f32.mrf.mxu1 }
 0x59d   : > { %v2994_v19 = vadd.f32 %v2993_v6, %v2972_v2  ;;  %v3174_v58 = vpop.f32.mrf.mxu0  ;;  %v3339_v41 = vpop.permute.xlu1 %3338 }
 0x59f   : > { %v3175_v59 = vadd.f32 %v3174_v58, %v2994_v19 }
 0x5a0   : > { %v3054_v49 = vpop.f32.mrf.mxu3  ;;  %v3126_v25 = vpop.f32.mrf.mxu2 }
 0x5a1   : > { %v3055_v52 = vadd.f32 %v3054_v49, %v3029_v56  ;;  %v3201_v9 = vadd.f32 %v3200_v38, %v3175_v59 }
 0x5a3   : > { %v3079_v31 = vadd.f32 %v3078_v62, %v3055_v52  ;;  %v3294_v48 = vpop.f32.mrf.mxu1 }
 0x5a5   : > { %v3103_v8 = vadd.f32 %v3102_v35, %v3079_v31  ;;  %v3272_v15 = vpop.f32.mrf.mxu0  ;;  %v3355_v47 = vpop.permute.xlu1 %3354 }
 0x5a7   : > { %v3127_v3 = vadd.f32 %v3126_v25, %v3103_v8 }
 0x5a8   : > { %v3148_v27 = vpop.f32.mrf.mxu3  ;;  %v3224_v10 = vpop.f32.mrf.mxu2 }
 0x5a9   : > { %v3149_v42 = vadd.f32 %v3148_v27, %v3127_v3  ;;  %v3225_v16 = vadd.f32 %v3224_v10, %v3201_v9 }
 0x5ab   : > { %v5019_v63 = vadd.f32 %v3301_v12, %v3149_v42 }
 0x5ad   : > { %3393 = vrot.lane.b32.xlu1 %v5019_v63, %s3638_s26  ;;  %3313 = vrot.lane.b32.xlu2 %v5019_v63, %s3637_s1  ;;  %v3449_v36 = vadd.f32 %v5033_v13, %v5019_v63  ;;  %v3371_v22 = vpop.permute.xlu1 %3370 }
 0x5af   : > { %3451 = vst [vmem:[%s5026_s4] sm:$0xf] %v3449_v36 }
 0x5b0   : > { %v3248_v55 = vpop.f32.mrf.mxu3 }
 0x5b1   : > { %v3249_v26 = vadd.f32 %v3248_v55, %v3225_v16 }
 0x5b3   : > { %v3273_v60 = vadd.f32 %v3272_v15, %v3249_v26 }
 0x5b5   : > { %v3295_v44 = vadd.f32 %v3294_v48, %v3273_v60  ;;  %3409 = vrot.lane.b32.xlu1 %v5019_v63, %s3640_s27  ;;  %3329 = vrot.lane.b32.xlu2 %v5019_v63, %s3631_s24  ;;  %v3403_v35 = vpop.permute.xlu1 %3402 }
 0x5b7   : > { %v3304_v1 = vadd.f32 %v3301_v12, %v3295_v44 }
 0x5b9   : > { %3315 = vrot.lane.b32.xlu0 %v3304_v1, %s3637_s1  ;;  %v3450_v45 = vadd.f32 %v3304_v1, %v4244_v11  ;;  %v3312_v55 = vmul.f32 %v3309_v28, %v3304_v1 }
 0x5bb   : > { %3452 = vst [vmem:[%s5026_s4 + $0x8] sm:$0xf] %v3450_v45 }
 0x5bd   : > { %3345 = vrot.lane.b32.xlu2 %v5019_v63, %s3636_s5  ;;  %3418 = vperm.xlu1 %3598, %v4993_v20  }
 0x5c1   : > { %3331 = vrot.lane.b32.xlu0 %v3304_v1, %s3631_s24 }
 0x5c5   : > { %3361 = vrot.lane.b32.xlu2 %v5019_v63, %s3620_s0 }
 0x5c9   : > { %3347 = vrot.lane.b32.xlu0 %v3304_v1, %s3636_s5 }
 0x5cd   : > { %3377 = vrot.lane.b32.xlu2 %v5019_v63, %s3626_s23 }
 0x5d1   : > { %3363 = vrot.lane.b32.xlu0 %v3304_v1, %s3620_s0 }
 0x5d5   : > { %3425 = vrot.lane.b32.xlu2 %v5019_v63, %s5230_s25 }
 0x5d9   : > { %3379 = vrot.lane.b32.xlu0 %v3304_v1, %s3626_s23 }
 0x5dd   : > { %3395 = vrot.lane.b32.xlu2 %v3304_v1, %s3638_s26 }
 0x5e1   : > { %3427 = vrot.lane.b32.xlu0 %v3304_v1, %s5230_s25 }
 0x5e5   : > { %3411 = vrot.lane.b32.xlu2 %v3304_v1, %s3640_s27 }
 0x5e9   : > { %3444 = vperm.xlu0 %3600, %v3441_v61  }
 0x5ed   : > { %3434 = vperm.xlu2 %3599, %v4993_v20  }
 0x607   : > { %v3314_v5 = vpop.permute.xlu2 %3313 }
 0x60f   : > { %v3330_v6 = vpop.permute.xlu2 %3329 }
 0x617   : > { %v3346_v14 = vpop.permute.xlu2 %3345 }
 0x61f   : > { %v3362_v24 = vpop.permute.xlu2 %3361  ;;  %v3394_v25 = vpop.permute.xlu1 %3393 }
 0x627   : > { %v3378_v7 = vpop.permute.xlu2 %3377 }
 0x62b   : > { %v3316_v62 = vpop.permute.xlu0 %3315 }
 0x62c   : > { %v3317_v20 = vsel %vm2523_vm10, %v3314_v5, %v3316_v62  ;;  %v3318_v52 = vsel %vm2523_vm10, %v3316_v62, %v3314_v5 }
 0x62d   : > { %v3319_v31 = vmul.f32 %v3318_v52, %v2526_v37  ;;  %v3320_v8 = vmul.f32 %v3317_v20, %v2527_v0 }
 0x62f   : > { %v5065_v49 = vpop.permute.xlu2 %3425  ;;  %v3325_v42 = vmul.f32 %v3323_v21, %v3319_v31  ;;  %v3326_v38 = vmul.f32 %v3323_v21, %v3320_v8 }
 0x631   : > { %v3328_v44 = vadd.f32 %v3326_v38, %v3312_v55 }
 0x633   : > { %v3332_v56 = vpop.permute.xlu0 %3331 }
 0x634   : > { %v3333_v19 = vsel %vm2542_vm12, %v3330_v6, %v3332_v56  ;;  %v3334_v58 = vsel %vm2542_vm12, %v3332_v56, %v3330_v6 }
 0x635   : > { %v3335_v59 = vmul.f32 %v3334_v58, %v2545_v54  ;;  %v3336_v37 = vmul.f32 %v3333_v19, %v2546_v40  ;;  %v3311_v54 = vmul.f32 %v3309_v28, %v5019_v63  ;;  %v3410_v63 = vpop.permute.xlu1 %3409 }
 0x637   : > { %v3396_v3 = vpop.permute.xlu2 %3395  ;;  %v3341_v15 = vmul.f32 %v3339_v41, %v3335_v59  ;;  %v3342_v40 = vmul.f32 %v3339_v41, %v3336_v37  ;;  %v3327_v60 = vadd.f32 %v3325_v42, %v3311_v54 }
 0x638   : > { %v3397_v45 = vsel %vm2618_vm15, %v3394_v25, %v3396_v3 }
 0x639   : > { %v3343_v1 = vadd.f32 %v3341_v15, %v3327_v60  ;;  %v3344_v28 = vadd.f32 %v3342_v40, %v3328_v44 }
 0x63b   : > { %v3348_v2 = vpop.permute.xlu0 %3347 }
 0x63c   : > { %v3349_v27 = vsel %vm2561_vm11, %v3346_v14, %v3348_v2  ;;  %v3350_v12 = vsel %vm2561_vm11, %v3348_v2, %v3346_v14 }
 0x63d   : > { %v3351_v36 = vmul.f32 %v3350_v12, %v2564_v43  ;;  %v3352_v16 = vmul.f32 %v3349_v27, %v2565_v46  ;;  %v3398_v43 = vsel %vm2618_vm15, %v3396_v3, %v3394_v25  ;;  %v3419_v58 = vpop.permute.xlu1 %3418 }
 0x63e   : > { %v3400_v41 = vmul.f32 %v3398_v43, %v2622_v34 }
 0x63f   : > { %v3357_v46 = vmul.f32 %v3355_v47, %v3351_v36  ;;  %v3358_v61 = vmul.f32 %v3355_v47, %v3352_v16  ;;  %v3412_v5 = vpop.permute.xlu2 %3411 }
 0x640   : > { %v3414_v34 = vsel %vm2637_vm0, %v3412_v5, %v3410_v63 }
 0x641   : > { %v3359_v47 = vadd.f32 %v3357_v46, %v3343_v1  ;;  %v3360_v62 = vadd.f32 %v3358_v61, %v3344_v28 }
 0x643   : > { %v3364_v0 = vpop.permute.xlu0 %3363 }
 0x644   : > { %v3365_v10 = vsel %vm2580_vm13, %v3362_v24, %v3364_v0  ;;  %v3366_v9 = vsel %vm2580_vm13, %v3364_v0, %v3362_v24 }
 0x645   : > { %v3367_v26 = vmul.f32 %v3366_v9, %v2583_v53  ;;  %v3368_v48 = vmul.f32 %v3365_v10, %v2584_v23  ;;  %v3399_v23 = vmul.f32 %v3397_v45, %v2621_v4  ;;  %v3413_v4 = vsel %vm2637_vm0, %v3410_v63, %v3412_v5 }
 0x646   : > { %v3415_v8 = vmul.f32 %v3413_v4, %v2640_v33 }
 0x647   : > { %v3373_v21 = vmul.f32 %v3371_v22, %v3367_v26  ;;  %v3374_v6 = vmul.f32 %v3371_v22, %v3368_v48  ;;  %v3405_v31 = vmul.f32 %v3403_v35, %v3399_v23 }
 0x648   : > { %v3421_v29 = vmul.f32 %v3419_v58, %v3415_v8 }
 0x649   : > { %v3375_v2 = vadd.f32 %v3373_v21, %v3359_v47  ;;  %v3376_v20 = vadd.f32 %v3374_v6, %v3360_v62 }
 0x64b   : > { %v3380_v53 = vpop.permute.xlu0 %3379 }
 0x64c   : > { %v3381_v14 = vsel %vm2599_vm14, %v3378_v7, %v3380_v53  ;;  %v3382_v24 = vsel %vm2599_vm14, %v3380_v53, %v3378_v7  ;;  %v3406_v7 = vmul.f32 %v3403_v35, %v3400_v41  ;;  %v3435_v35 = vpop.permute.xlu2 %3434 }
 0x64d   : > { %v3383_v56 = vmul.f32 %v3381_v14, %v2602_v39  ;;  %v3384_v22 = vmul.f32 %v3382_v24, %v2603_v57  ;;  %v3416_v39 = vmul.f32 %v3414_v34, %v2641_v30 }
 0x64f   : > { %v3389_v52 = vmul.f32 %v3387_v51, %v3383_v56  ;;  %v3390_v25 = vmul.f32 %v3387_v51, %v3384_v22  ;;  %v3422_v33 = vmul.f32 %v3419_v58, %v3416_v39 }
 0x651   : > { %v3391_v19 = vadd.f32 %v3389_v52, %v3375_v2  ;;  %v3392_v57 = vadd.f32 %v3390_v25, %v3376_v20 }
 0x653   : > { %v3428_v3 = vpop.permute.xlu0 %3427  ;;  %v3407_v27 = vadd.f32 %v3405_v31, %v3391_v19  ;;  %v3408_v12 = vadd.f32 %v3406_v7, %v3392_v57 }
 0x654   : > { %v3429_v59 = vsel %vm2656_vm2, %v5065_v49, %v3428_v3  ;;  %v3430_v51 = vsel %vm2656_vm2, %v3428_v3, %v5065_v49 }
 0x655   : > { %v3431_v50 = vmul.f32 %v4949_v17, %v3429_v59  ;;  %v3432_v30 = vmul.f32 %v4954_v32, %v3430_v51  ;;  %v3423_v42 = vadd.f32 %v3421_v29, %v3407_v27  ;;  %v3424_v38 = vadd.f32 %v3422_v33, %v3408_v12 }
 0x657   : > { %v3437_v37 = vmul.f32 %v3435_v35, %v3431_v50  ;;  %v3438_v0 = vmul.f32 %v3435_v35, %v3432_v30 }
 0x659   : > { %v3439_v10 = vadd.f32 %v3437_v37, %v3423_v42  ;;  %v3440_v9 = vadd.f32 %v3438_v0, %v3424_v38 }
 0x65b   : > { %v3445_v36 = vpop.permute.xlu0 %3444 }
 0x65c   : > { %v3447_v16 = vadd.f32 %v3445_v36, %v3439_v10  ;;  %v3448_v54 = vadd.f32 %v3445_v36, %v3440_v9 }
 0x65e   : > { %v3455_v18 = vrot.slane %v3447_v16, 4  ;;  %v3456_v49 = vrot.slane %v3448_v54, 4 }
 0x660   : > { %v3459_v55 = vadd.f32 %v5033_v13, %v3455_v18  ;;  %v3460_v15 = vadd.f32 %v3456_v49, %v4244_v11 }
 0x662   : > { %3461 = vst [vmem:[%s5026_s4] sm:$0xf0] %v3459_v55 }
 0x663   : > { %3462 = vst [vmem:[%s5026_s4 + $0x8] sm:$0xf0] %v3460_v15 }
 0x664 PF: > { %s31_s2 = sadd.s32 1, %s3614_s2  }
 0x665   : > { %p28_p4 = scmp.ge.s32.totalorder %s31_s2, 4  }
 0x667   :  { %30 = sbr.rel (!%p28_p4) target bundleno = 7 (0x7), region = 134 }

</bundles_post_ra>
